<compile_context>
chip_gen: v6e
topology: v6e:2x2x1
jax: 0.10.0
libtpu: 0.0.40
codegen_flags: <defaults>
</compile_context>

<pallas_src>
import math

import jax
import jax.numpy as jnp
from jax import lax
from jax.experimental import pallas as pl
from jax.experimental.pallas import tpu as pltpu

_F32 = jnp.float32
_BF16 = jnp.bfloat16


def _layernorm(x, gamma, beta, eps=1e-5):
    # PyTorch nn.LayerNorm: biased variance over the last dim, eps inside rsqrt.
    mu = jnp.mean(x, axis=-1, keepdims=True)
    var = jnp.mean((x - mu) ** 2, axis=-1, keepdims=True)
    return (x - mu) * lax.rsqrt(var + eps) * gamma + beta


def _gelu_exact(x):
    # PyTorch nn.GELU() default = exact (erf) GELU.
    # TODO(synk): jax.nn.gelu(approximate=True) would move this to the EUP but
    # changes numerics vs the PyTorch module, so the exact erf form is kept.
    return 0.5 * x * (1.0 + lax.erf(x * (1.0 / math.sqrt(2.0))))


# --------------------------- kernel 1: LN1 + K/V ------------------------------
def _kv_projection_kernel(x_ref, g1_ref, b1_ref, wk_ref, wv_ref, bv_ref,
                          kt_ref, v_ref):
    n_head = kt_ref.shape[1]
    d_head = kt_ref.shape[2]

    ln1 = _layernorm(x_ref[0], g1_ref[...], b1_ref[...]).astype(_BF16)  # (TK, D)
    # Full-width (TK, D) x (D, D) projections: MXU column dim fully utilized.
    k = jnp.dot(ln1, wk_ref[...], preferred_element_type=_F32)          # (TK, D)
    v = jnp.dot(ln1, wv_ref[...], preferred_element_type=_F32) + bv_ref[...]

    # Split into head-major layouts once (amortized over every query tile).
    # K is stored transposed (H, d, T) so the score matmul gets a (K, N) RHS.
    for h in range(n_head):
        sl = slice(h * d_head, (h + 1) * d_head)
        kt_ref[0, h] = k[:, sl].T.astype(_BF16)     # (d, TK)
        v_ref[0, h] = v[:, sl].astype(_BF16)        # (TK, d)


# --------------------- kernel 2: attention + residual + MLP -------------------
def _attn_mlp_kernel(xt_ref, kt_ref, v_ref,
                     g1_ref, b1_ref, wq_ref, bq_ref, wo_ref, bo_ref,
                     g2_ref, b2_ref, w1_ref, bm1_ref, w2_ref, bm2_ref,
                     o_ref, o_scr):
    n_head = kt_ref.shape[1]
    d_head = kt_ref.shape[2]
    n_chunks = w1_ref.shape[0]

    x_t = xt_ref[0]                                                   # (TQ, D) f32
    ln1 = _layernorm(x_t, g1_ref[...], b1_ref[...]).astype(_BF16)
    # Single full-width Q projection; 1/sqrt(d) is folded into Wq/bq already.
    q = (jnp.dot(ln1, wq_ref[...], preferred_element_type=_F32)
         + bq_ref[...]).astype(_BF16)                                  # (TQ, D)

    # Head loop: fully unrolled (static H) so the LLO scheduler overlaps the
    # softmax VPU/EUP/XLU work of head h with the MXU matmuls of head h+1.
    for h in range(n_head):
        sl = slice(h * d_head, (h + 1) * d_head)
        qh = q[:, sl]                                                  # (TQ, d)
        kth = kt_ref[0, h]                                             # (d, T) bf16
        vh = v_ref[0, h]                                               # (T, d) bf16
        s = jnp.dot(qh, kth, preferred_element_type=_F32)              # (TQ, T)
        m = jnp.max(s, axis=-1, keepdims=True)
        # exp in bf16 (2x EUP throughput on v6e/v7x); row-sum / recip in f32.
        p = jnp.exp((s - m).astype(_BF16))
        l = jnp.sum(p.astype(_F32), axis=-1, keepdims=True)
        inv_l = pl.reciprocal(l, approx=True)
        oh = jnp.dot(p, vh, preferred_element_type=_F32) * inv_l       # (TQ, d)
        o_scr[:, sl] = oh.astype(_BF16)

    # One full-depth (TQ, D) x (D, D) output projection instead of H K=d ones.
    attn = jnp.dot(o_scr[...], wo_ref[...], preferred_element_type=_F32)
    x1 = x_t + attn + bo_ref[...]                                      # (TQ, D) f32

    # MLP, chunked over the hidden dimension, f32 accumulation, unrolled.
    ln2 = _layernorm(x1, g2_ref[...], b2_ref[...]).astype(_BF16)
    mlp = jnp.zeros(x1.shape, _F32)
    for c in range(n_chunks):
        hc = jnp.dot(ln2, w1_ref[c], preferred_element_type=_F32) + bm1_ref[c]
        hc = _gelu_exact(hc).astype(_BF16)                             # (TQ, CH)
        mlp = mlp + jnp.dot(hc, w2_ref[c], preferred_element_type=_F32)

    o_ref[0] = (x1 + mlp + bm2_ref[...]).astype(o_ref.dtype)


# --------------------------------- wrapper ------------------------------------
def _pick_tile(total, want, quantum):
    """Largest multiple of `quantum` <= want that divides `total`, else total."""
    if total % quantum != 0:
        return total
    t = (min(want, total) // quantum) * quantum
    while t >= quantum:
        if total % t == 0:
            return t
        t -= quantum
    return total


def _const_spec(arr, single_buffer):
    """Full-array spec for a constant (grid-invariant) weight input."""
    nd = arr.ndim
    index_map = lambda b, i: (0,) * nd
    if single_buffer:
        # Constant index_map -> double buffering buys nothing; halve residency.
        return pl.BlockSpec(arr.shape, index_map, pipeline_mode=pl.Buffered(1))
    return pl.BlockSpec(arr.shape, index_map)


def _vmem_limit(estimate_bytes):
    """Size the scoped VMEM limit from the footprint, clamped to physical VMEM."""
    cap = 64 * 1024 * 1024
    try:
        cap = int(pltpu.get_tpu_info().vmem_capacity_bytes)
    except Exception:
        pass
    want = max(32 * 1024 * 1024, int(1.5 * estimate_bytes))
    return int(min(want, int(0.9 * cap)))


def _nbytes(a):
    return int(a.size) * int(a.dtype.itemsize)


def _forward(x, params, n_head, *, q_tile, kv_tile, dh_chunk, single_buffer_weights):
    (g1, b1, wq, bq, wk, wv, bv, wo, bo, g2, b2, w1, bm1, w2, bm2) = params
    B, T, D = x.shape
    H = n_head
    assert D % H == 0, "n_state must be divisible by n_head"
    d = D // H
    Dh = w1.shape[-1]

    # Tile sizes.  The K^T output block has T-tiles on the lane axis, so KV
    # tiles must be 128-aligned (or the full sequence).  Query tiles need 8.
    TK = _pick_tile(T, kv_tile, 128)
    TQ = _pick_tile(T, q_tile, 8)
    CH = _pick_tile(Dh, dh_chunk, 128)
    NK, NQ, NCH = T // TK, T // TQ, Dh // CH
    scale = 1.0 / math.sqrt(d)

    # ---- parameter prep (plain JAX, outside the kernels) --------------------
    g1_f = g1.reshape(1, D).astype(_F32)
    b1_f = b1.reshape(1, D).astype(_F32)
    g2_f = g2.reshape(1, D).astype(_F32)
    b2_f = b2.reshape(1, D).astype(_F32)
    wq_s = (wq * scale).astype(_BF16)                       # scale folded into Wq
    bq_s = (bq * scale).reshape(1, D).astype(_F32)
    wk_b = wk.astype(_BF16)
    wv_b = wv.astype(_BF16)
    bv_f = bv.reshape(1, D).astype(_F32)
    wo_b = wo.astype(_BF16)                                 # rows already head-major
    bo_f = bo.reshape(1, D).astype(_F32)
    w1_c = w1.reshape(D, NCH, CH).transpose(1, 0, 2).astype(_BF16)   # (NCH, D, CH)
    bm1_c = bm1.reshape(NCH, 1, CH).astype(_F32)
    w2_c = w2.reshape(NCH, CH, D).astype(_BF16)                      # (NCH, CH, D)
    bm2_f = bm2.reshape(1, D).astype(_F32)

    # ---------------- pallas_call #1: LN1 + K/V projection -------------------
    kv_consts = (g1_f, b1_f, wk_b, wv_b, bv_f)
    wb1 = sum(_nbytes(c) for c in kv_consts)
    est1 = (wb1 * (1 if single_buffer_weights else 2)
            + 2 * (TK * D * 4)                       # x tiles (double-buffered)
            + 2 * (2 * H * d * TK * 2)               # K^T / V output tiles
            + 6 * (TK * D * 4))                      # in-kernel f32 temporaries
    kt, vhm = pl.pallas_call(
        _kv_projection_kernel,
        out_shape=(jax.ShapeDtypeStruct((B, H, d, T), _BF16),
                   jax.ShapeDtypeStruct((B, H, T, d), _BF16)),
        grid_spec=pltpu.PrefetchScalarGridSpec(
            num_scalar_prefetch=0,
            grid=(B, NK),
            in_specs=[pl.BlockSpec((1, TK, D), lambda b, t: (b, t, 0))]
                     + [_const_spec(c, single_buffer_weights) for c in kv_consts],
            out_specs=(pl.BlockSpec((1, H, d, TK), lambda b, t: (b, 0, 0, t)),
                       pl.BlockSpec((1, H, TK, d), lambda b, t: (b, 0, t, 0))),
        ),
        compiler_params=pltpu.CompilerParams(
            dimension_semantics=("parallel", "parallel"),
            vmem_limit_bytes=_vmem_limit(est1),
        ),
        cost_estimate=pl.CostEstimate(
            flops=int(4 * B * T * D * D),
            transcendentals=int(B * T),
            bytes_accessed=int(B * T * D * 4 + 2 * B * T * D * 2 + 2 * D * D * 2),
        ),
    )(x, *kv_consts)

    # ------------- pallas_call #2: attention + residual + MLP ----------------
    blk_consts = (g1_f, b1_f, wq_s, bq_s, wo_b, bo_f,
                  g2_f, b2_f, w1_c, bm1_c, w2_c, bm2_f)
    wb2 = sum(_nbytes(c) for c in blk_consts)
    kv_bytes = 2 * H * T * d * 2                      # per-batch K^T + V (bf16)
    est2 = (wb2 * (1 if single_buffer_weights else 2)
            + 2 * kv_bytes                            # double-buffered K/V blocks
            + 4 * (TQ * D * 4)                        # x / out tiles
            + 4 * (TQ * T * 4)                        # score temporaries
            + 4 * (TQ * CH * 4)                       # MLP chunk temporaries
            + TQ * D * 2)                             # o_scr

    in_specs = (
        [pl.BlockSpec((1, TQ, D), lambda b, q: (b, q, 0)),          # query tile
         pl.BlockSpec((1, H, d, T), lambda b, q: (b, 0, 0, 0)),     # K^T (per batch)
         pl.BlockSpec((1, H, T, d), lambda b, q: (b, 0, 0, 0))]     # V   (per batch)
        + [_const_spec(c, single_buffer_weights) for c in blk_consts])

    flops2 = int(4 * B * T * D * D            # Q + Wo projections
                 + 4 * B * H * T * T * d      # scores + PV
                 + 4 * B * T * D * Dh)        # MLP
    return pl.pallas_call(
        _attn_mlp_kernel,
        out_shape=jax.ShapeDtypeStruct((B, T, D), x.dtype),
        grid_spec=pltpu.PrefetchScalarGridSpec(
            num_scalar_prefetch=0,
            grid=(B, NQ),
            in_specs=in_specs,
            out_specs=pl.BlockSpec((1, TQ, D), lambda b, q: (b, q, 0)),
            scratch_shapes=[pltpu.VMEM((TQ, D), _BF16)],    # per-head context slab
        ),
        compiler_params=pltpu.CompilerParams(
            # K/V were hoisted out, so the query-tile axis is parallel too
            # (keeps both v7x TensorCores busy even at batch 1).
            dimension_semantics=("parallel", "parallel"),
            vmem_limit_bytes=_vmem_limit(est2),
        ),
        cost_estimate=pl.CostEstimate(
            flops=flops2,
            transcendentals=int(B * H * T * T + B * T * Dh),
            bytes_accessed=int(2 * B * T * D * 4 + B * kv_bytes + wb2),
        ),
    )(x, kt, vhm, *blk_consts)


def residual_attention_block(x, params, n_head, *, q_tile=256, kv_tile=512,
                             dh_chunk=512):
    """x = x + attn(LN(x)); x = x + MLP(LN(x))  (Whisper ResidualAttentionBlock)."""
    kwargs = dict(q_tile=q_tile, kv_tile=kv_tile, dh_chunk=dh_chunk)
    try:
        return _forward(x, params, n_head, single_buffer_weights=True, **kwargs)
    except Exception:
        # Fallback for JAX builds where pl.Buffered(1) single-buffering of
        # constant-index weight inputs is not supported by pallas_call.
        return _forward(x, params, n_head, single_buffer_weights=False, **kwargs)


# --------------- pure-JAX reference (mirrors the PyTorch forward) ------------
# With compute_dtype=jnp.float32 this is exactly the PyTorch math; with
# compute_dtype=jnp.bfloat16 it mirrors the kernel's MXU precision policy
# (bf16 matmul inputs, f32 accumulation) for a tight numeric comparison.
def reference_block(x, params, n_head, compute_dtype=jnp.float32):
    (g1, b1, wq, bq, wk, wv, bv, wo, bo, g2, b2, w1, bm1, w2, bm2) = params
    B, T, D = x.shape
    d = D // n_head
    scale = 1.0 / math.sqrt(d)
    cd = compute_dtype

    def mm(a, w):
        return jnp.dot(a.astype(cd), w.astype(cd),
                       preferred_element_type=jnp.float32)

    ln1 = _layernorm(x, g1, b1)
    q = (mm(ln1, wq * scale) + bq * scale).astype(cd)   # scale folded (as in kernel)
    k = mm(ln1, wk).astype(cd)
    v = (mm(ln1, wv) + bv).astype(cd)

    qh = q.reshape(B, T, n_head, d).transpose(0, 2, 1, 3)
    kh = k.reshape(B, T, n_head, d).transpose(0, 2, 1, 3)
    vh = v.reshape(B, T, n_head, d).transpose(0, 2, 1, 3)
    s = jnp.einsum("bhtd,bhsd->bhts", qh, kh, preferred_element_type=jnp.float32)
    p = jax.nn.softmax(s, axis=-1)
    o = jnp.einsum("bhts,bhsd->bhtd", p.astype(cd), vh,
                   preferred_element_type=jnp.float32)
    o = o.transpose(0, 2, 1, 3).reshape(B, T, D)
    x1 = x + mm(o, wo) + bo

    ln2 = _layernorm(x1, g2, b2)
    h = _gelu_exact(mm(ln2, w1) + bm1)
    return x1 + mm(h, w2) + bm2


if __name__ == "__main__":
    B, T, D, H = 2, 16, 128, 4
    Dh = 4 * D

    key = jax.random.PRNGKey(0)
    keys = jax.random.split(key, 16)

    def rnd(k, shape, scale=0.1):
        return (scale * jax.random.normal(k, shape)).astype(jnp.float32)

    x = rnd(keys[0], (B, T, D), scale=1.0)

    # nn.Linear weights stored (in, out) == torch weight.T, so y = x @ W + b.
    g1 = 1.0 + rnd(keys[1], (1, D));   b1 = rnd(keys[2], (1, D))
    wq = rnd(keys[3], (D, D));         bq = rnd(keys[4], (1, D))
    wk = rnd(keys[5], (D, D))                                  # key: bias=False
    wv = rnd(keys[6], (D, D));         bv = rnd(keys[7], (1, D))
    wo = rnd(keys[8], (D, D));         bo = rnd(keys[9], (1, D))
    g2 = 1.0 + rnd(keys[10], (1, D));  b2 = rnd(keys[11], (1, D))
    w1 = rnd(keys[12], (D, Dh));       bm1 = rnd(keys[13], (1, Dh))
    w2 = rnd(keys[14], (Dh, D));       bm2 = rnd(keys[15], (1, D))

    params = (g1, b1, wq, bq, wk, wv, bv, wo, bo, g2, b2, w1, bm1, w2, bm2)

    # Small tiles so the query-tile grid axis and the MLP chunk loop are both
    # exercised (attention grid = (2, 2), 4 hidden chunks).
    out = residual_attention_block(x, params, n_head=H, q_tile=8, dh_chunk=128)
    out = jax.block_until_ready(out)

    ref = jax.block_until_ready(
        reference_block(x, params, n_head=H, compute_dtype=jnp.bfloat16))

    assert out.shape == (B, T, D)
    err = float(jnp.max(jnp.abs(out - ref)))
    # bf16 MXU inputs + bf16 exp + approx softmax reciprocal => loose tolerance.
    assert jnp.allclose(out, ref, rtol=5e-2, atol=5e-2), f"max abs err = {err}"
    print("KERNEL_OK")
</pallas_src>

<mosaic_0001>
module attributes {stable_mosaic.version = 11 : i64} {
  func.func @_kv_projection_kernel(%arg0: i32, %arg1: i32, %arg2: memref<1x16x128xf32, #tpu.memory_space<vmem>>, %arg3: memref<1x128xf32, #tpu.memory_space<vmem>>, %arg4: memref<1x128xf32, #tpu.memory_space<vmem>>, %arg5: memref<128x128xbf16, #tpu.memory_space<vmem>>, %arg6: memref<128x128xbf16, #tpu.memory_space<vmem>>, %arg7: memref<1x128xf32, #tpu.memory_space<vmem>>, %arg8: memref<1x4x32x16xbf16, #tpu.memory_space<vmem>>, %arg9: memref<1x4x16x32xbf16, #tpu.memory_space<vmem>>) attributes {dimension_semantics = [#tpu.dimension_semantics<parallel>, #tpu.dimension_semantics<parallel>], iteration_bounds = array<i64: 2, 1>, scalar_prefetch = 0 : i64, scratch_operands = 0 : i64, tpu.core_type = #tpu.core_type<tc>, window_params = [{transform_indices = @transform_0, window_bounds = array<i64: 1, 16, 128>}, {pipeline_mode = #tpu.pipeline_mode<synchronous>, transform_indices = @transform_1, window_bounds = array<i64: 1, 128>}, {pipeline_mode = #tpu.pipeline_mode<synchronous>, transform_indices = @transform_2, window_bounds = array<i64: 1, 128>}, {pipeline_mode = #tpu.pipeline_mode<synchronous>, transform_indices = @transform_3, window_bounds = array<i64: 128, 128>}, {pipeline_mode = #tpu.pipeline_mode<synchronous>, transform_indices = @transform_4, window_bounds = array<i64: 128, 128>}, {pipeline_mode = #tpu.pipeline_mode<synchronous>, transform_indices = @transform_5, window_bounds = array<i64: 1, 128>}, {transform_indices = @transform_6, window_bounds = array<i64: 1, 4, 32, 16>}, {transform_indices = @transform_7, window_bounds = array<i64: 1, 4, 16, 32>}]} {
    %c0 = arith.constant 0 : index
    %c0_0 = arith.constant 0 : index
    %c0_1 = arith.constant 0 : index
    %0 = vector.load %arg2[%c0, %c0_0, %c0_1] : memref<1x16x128xf32, #tpu.memory_space<vmem>>, vector<1x16x128xf32>
    %1 = vector.shape_cast %0 : vector<1x16x128xf32> to vector<16x128xf32>
    %c0_2 = arith.constant 0 : index
    %c0_3 = arith.constant 0 : index
    %2 = vector.load %arg3[%c0_2, %c0_3] : memref<1x128xf32, #tpu.memory_space<vmem>>, vector<1x128xf32>
    %c0_4 = arith.constant 0 : index
    %c0_5 = arith.constant 0 : index
    %3 = vector.load %arg4[%c0_4, %c0_5] : memref<1x128xf32, #tpu.memory_space<vmem>>, vector<1x128xf32>
    %cst = arith.constant dense<0.000000e+00> : vector<16xf32>
    %4 = vector.multi_reduction <add>, %1, %cst [1] : vector<16x128xf32> to vector<16xf32>
    %5 = vector.shape_cast %4 : vector<16xf32> to vector<16x1xf32>
    %cst_6 = arith.constant 1.280000e+02 : f32
    %6 = vector.broadcast %cst_6 : f32 to vector<16x1xf32>
    %7 = arith.divf %5, %6 : vector<16x1xf32>
    %8 = vector.broadcast %7 : vector<16x1xf32> to vector<16x128xf32>
    %9 = arith.subf %1, %8 : vector<16x128xf32>
    %10 = arith.mulf %9, %9 : vector<16x128xf32>
    %cst_7 = arith.constant dense<0.000000e+00> : vector<16xf32>
    %11 = vector.multi_reduction <add>, %10, %cst_7 [1] : vector<16x128xf32> to vector<16xf32>
    %12 = vector.shape_cast %11 : vector<16xf32> to vector<16x1xf32>
    %cst_8 = arith.constant 1.280000e+02 : f32
    %13 = vector.broadcast %cst_8 : f32 to vector<16x1xf32>
    %14 = arith.divf %12, %13 : vector<16x1xf32>
    %15 = vector.broadcast %7 : vector<16x1xf32> to vector<16x128xf32>
    %16 = arith.subf %1, %15 : vector<16x128xf32>
    %cst_9 = arith.constant 9.99999974E-6 : f32
    %17 = vector.broadcast %cst_9 : f32 to vector<16x1xf32>
    %18 = arith.addf %14, %17 : vector<16x1xf32>
    %19 = math.rsqrt %18 : vector<16x1xf32>
    %20 = vector.broadcast %19 : vector<16x1xf32> to vector<16x128xf32>
    %21 = arith.mulf %16, %20 : vector<16x128xf32>
    %22 = vector.broadcast %2 : vector<1x128xf32> to vector<16x128xf32>
    %23 = arith.mulf %21, %22 : vector<16x128xf32>
    %24 = vector.broadcast %3 : vector<1x128xf32> to vector<16x128xf32>
    %25 = arith.addf %23, %24 : vector<16x128xf32>
    %26 = arith.truncf %25 : vector<16x128xf32> to vector<16x128xbf16>
    %c0_10 = arith.constant 0 : index
    %c0_11 = arith.constant 0 : index
    %27 = vector.load %arg5[%c0_10, %c0_11] : memref<128x128xbf16, #tpu.memory_space<vmem>>, vector<128x128xbf16>
    %cst_12 = arith.constant dense<0.000000e+00> : vector<16x128xf32>
    %28 = tpu.matmul %26, %27, %cst_12 {dimension_numbers = #tpu.dot_dimension_numbers<[1], [0], [0], [1], [0, 0, 1, 1], [], []>} : vector<16x128xbf16>, vector<128x128xbf16>, vector<16x128xf32> -> vector<16x128xf32>
    %c0_13 = arith.constant 0 : index
    %c0_14 = arith.constant 0 : index
    %29 = vector.load %arg6[%c0_13, %c0_14] : memref<128x128xbf16, #tpu.memory_space<vmem>>, vector<128x128xbf16>
    %cst_15 = arith.constant dense<0.000000e+00> : vector<16x128xf32>
    %30 = tpu.matmul %26, %29, %cst_15 {dimension_numbers = #tpu.dot_dimension_numbers<[1], [0], [0], [1], [0, 0, 1, 1], [], []>} : vector<16x128xbf16>, vector<128x128xbf16>, vector<16x128xf32> -> vector<16x128xf32>
    %c0_16 = arith.constant 0 : index
    %c0_17 = arith.constant 0 : index
    %31 = vector.load %arg7[%c0_16, %c0_17] : memref<1x128xf32, #tpu.memory_space<vmem>>, vector<1x128xf32>
    %32 = vector.broadcast %31 : vector<1x128xf32> to vector<16x128xf32>
    %33 = arith.addf %30, %32 : vector<16x128xf32>
    %34 = vector.extract_strided_slice %28 {offsets = [0, 0], sizes = [16, 32], strides = [1, 1]} : vector<16x128xf32> to vector<16x32xf32>
    %35 = tpu.transpose %34, [1, 0] : vector<16x32xf32> -> vector<32x16xf32>
    %36 = arith.truncf %35 : vector<32x16xf32> to vector<32x16xbf16>
    %c0_18 = arith.constant 0 : index
    %c0_19 = arith.constant 0 : index
    %c0_20 = arith.constant 0 : index
    %c0_21 = arith.constant 0 : index
    %37 = vector.load %arg8[%c0_18, %c0_19, %c0_20, %c0_21] : memref<1x4x32x16xbf16, #tpu.memory_space<vmem>>, vector<1x1x32x16xbf16>
    %38 = vector.shape_cast %37 : vector<1x1x32x16xbf16> to vector<32x16xbf16>
    %39 = vector.shape_cast %36 : vector<32x16xbf16> to vector<1x1x32x16xbf16>
    tpu.vector_store %arg8[%c0_18, %c0_19, %c0_20, %c0_21], %39 {strides = array<i32>} : memref<1x4x32x16xbf16, #tpu.memory_space<vmem>>, vector<1x1x32x16xbf16>,
    %40 = vector.extract_strided_slice %33 {offsets = [0, 0], sizes = [16, 32], strides = [1, 1]} : vector<16x128xf32> to vector<16x32xf32>
    %41 = arith.truncf %40 : vector<16x32xf32> to vector<16x32xbf16>
    %c0_22 = arith.constant 0 : index
    %c0_23 = arith.constant 0 : index
    %c0_24 = arith.constant 0 : index
    %c0_25 = arith.constant 0 : index
    %42 = vector.load %arg9[%c0_22, %c0_23, %c0_24, %c0_25] : memref<1x4x16x32xbf16, #tpu.memory_space<vmem>>, vector<1x1x16x32xbf16>
    %43 = vector.shape_cast %42 : vector<1x1x16x32xbf16> to vector<16x32xbf16>
    %44 = vector.shape_cast %41 : vector<16x32xbf16> to vector<1x1x16x32xbf16>
    tpu.vector_store %arg9[%c0_22, %c0_23, %c0_24, %c0_25], %44 {strides = array<i32>} : memref<1x4x16x32xbf16, #tpu.memory_space<vmem>>, vector<1x1x16x32xbf16>,
    %45 = vector.extract_strided_slice %28 {offsets = [0, 32], sizes = [16, 32], strides = [1, 1]} : vector<16x128xf32> to vector<16x32xf32>
    %46 = tpu.transpose %45, [1, 0] : vector<16x32xf32> -> vector<32x16xf32>
    %47 = arith.truncf %46 : vector<32x16xf32> to vector<32x16xbf16>
    %c0_26 = arith.constant 0 : index
    %c1 = arith.constant 1 : index
    %c0_27 = arith.constant 0 : index
    %c0_28 = arith.constant 0 : index
    %48 = vector.load %arg8[%c0_26, %c1, %c0_27, %c0_28] : memref<1x4x32x16xbf16, #tpu.memory_space<vmem>>, vector<1x1x32x16xbf16>
    %49 = vector.shape_cast %48 : vector<1x1x32x16xbf16> to vector<32x16xbf16>
    %50 = vector.shape_cast %47 : vector<32x16xbf16> to vector<1x1x32x16xbf16>
    tpu.vector_store %arg8[%c0_26, %c1, %c0_27, %c0_28], %50 {strides = array<i32>} : memref<1x4x32x16xbf16, #tpu.memory_space<vmem>>, vector<1x1x32x16xbf16>,
    %51 = vector.extract_strided_slice %33 {offsets = [0, 32], sizes = [16, 32], strides = [1, 1]} : vector<16x128xf32> to vector<16x32xf32>
    %52 = arith.truncf %51 : vector<16x32xf32> to vector<16x32xbf16>
    %c0_29 = arith.constant 0 : index
    %c1_30 = arith.constant 1 : index
    %c0_31 = arith.constant 0 : index
    %c0_32 = arith.constant 0 : index
    %53 = vector.load %arg9[%c0_29, %c1_30, %c0_31, %c0_32] : memref<1x4x16x32xbf16, #tpu.memory_space<vmem>>, vector<1x1x16x32xbf16>
    %54 = vector.shape_cast %53 : vector<1x1x16x32xbf16> to vector<16x32xbf16>
    %55 = vector.shape_cast %52 : vector<16x32xbf16> to vector<1x1x16x32xbf16>
    tpu.vector_store %arg9[%c0_29, %c1_30, %c0_31, %c0_32], %55 {strides = array<i32>} : memref<1x4x16x32xbf16, #tpu.memory_space<vmem>>, vector<1x1x16x32xbf16>,
    %56 = vector.extract_strided_slice %28 {offsets = [0, 64], sizes = [16, 32], strides = [1, 1]} : vector<16x128xf32> to vector<16x32xf32>
    %57 = tpu.transpose %56, [1, 0] : vector<16x32xf32> -> vector<32x16xf32>
    %58 = arith.truncf %57 : vector<32x16xf32> to vector<32x16xbf16>
    %c0_33 = arith.constant 0 : index
    %c2 = arith.constant 2 : index
    %c0_34 = arith.constant 0 : index
    %c0_35 = arith.constant 0 : index
    %59 = vector.load %arg8[%c0_33, %c2, %c0_34, %c0_35] : memref<1x4x32x16xbf16, #tpu.memory_space<vmem>>, vector<1x1x32x16xbf16>
    %60 = vector.shape_cast %59 : vector<1x1x32x16xbf16> to vector<32x16xbf16>
    %61 = vector.shape_cast %58 : vector<32x16xbf16> to vector<1x1x32x16xbf16>
    tpu.vector_store %arg8[%c0_33, %c2, %c0_34, %c0_35], %61 {strides = array<i32>} : memref<1x4x32x16xbf16, #tpu.memory_space<vmem>>, vector<1x1x32x16xbf16>,
    %62 = vector.extract_strided_slice %33 {offsets = [0, 64], sizes = [16, 32], strides = [1, 1]} : vector<16x128xf32> to vector<16x32xf32>
    %63 = arith.truncf %62 : vector<16x32xf32> to vector<16x32xbf16>
    %c0_36 = arith.constant 0 : index
    %c2_37 = arith.constant 2 : index
    %c0_38 = arith.constant 0 : index
    %c0_39 = arith.constant 0 : index
    %64 = vector.load %arg9[%c0_36, %c2_37, %c0_38, %c0_39] : memref<1x4x16x32xbf16, #tpu.memory_space<vmem>>, vector<1x1x16x32xbf16>
    %65 = vector.shape_cast %64 : vector<1x1x16x32xbf16> to vector<16x32xbf16>
    %66 = vector.shape_cast %63 : vector<16x32xbf16> to vector<1x1x16x32xbf16>
    tpu.vector_store %arg9[%c0_36, %c2_37, %c0_38, %c0_39], %66 {strides = array<i32>} : memref<1x4x16x32xbf16, #tpu.memory_space<vmem>>, vector<1x1x16x32xbf16>,
    %67 = vector.extract_strided_slice %28 {offsets = [0, 96], sizes = [16, 32], strides = [1, 1]} : vector<16x128xf32> to vector<16x32xf32>
    %68 = tpu.transpose %67, [1, 0] : vector<16x32xf32> -> vector<32x16xf32>
    %69 = arith.truncf %68 : vector<32x16xf32> to vector<32x16xbf16>
    %c0_40 = arith.constant 0 : index
    %c3 = arith.constant 3 : index
    %c0_41 = arith.constant 0 : index
    %c0_42 = arith.constant 0 : index
    %70 = vector.load %arg8[%c0_40, %c3, %c0_41, %c0_42] : memref<1x4x32x16xbf16, #tpu.memory_space<vmem>>, vector<1x1x32x16xbf16>
    %71 = vector.shape_cast %70 : vector<1x1x32x16xbf16> to vector<32x16xbf16>
    %72 = vector.shape_cast %69 : vector<32x16xbf16> to vector<1x1x32x16xbf16>
    tpu.vector_store %arg8[%c0_40, %c3, %c0_41, %c0_42], %72 {strides = array<i32>} : memref<1x4x32x16xbf16, #tpu.memory_space<vmem>>, vector<1x1x32x16xbf16>,
    %73 = vector.extract_strided_slice %33 {offsets = [0, 96], sizes = [16, 32], strides = [1, 1]} : vector<16x128xf32> to vector<16x32xf32>
    %74 = arith.truncf %73 : vector<16x32xf32> to vector<16x32xbf16>
    %c0_43 = arith.constant 0 : index
    %c3_44 = arith.constant 3 : index
    %c0_45 = arith.constant 0 : index
    %c0_46 = arith.constant 0 : index
    %75 = vector.load %arg9[%c0_43, %c3_44, %c0_45, %c0_46] : memref<1x4x16x32xbf16, #tpu.memory_space<vmem>>, vector<1x1x16x32xbf16>
    %76 = vector.shape_cast %75 : vector<1x1x16x32xbf16> to vector<16x32xbf16>
    %77 = vector.shape_cast %74 : vector<16x32xbf16> to vector<1x1x16x32xbf16>
    tpu.vector_store %arg9[%c0_43, %c3_44, %c0_45, %c0_46], %77 {strides = array<i32>} : memref<1x4x16x32xbf16, #tpu.memory_space<vmem>>, vector<1x1x16x32xbf16>,
    return
  }
  func.func @transform_0(%arg0: i32, %arg1: i32) -> (i32, i32, i32) {
    %c0_i32 = arith.constant 0 : i32
    %c0_i32_0 = arith.constant 0 : i32
    return %arg0, %arg1, %c0_i32 : i32, i32, i32
  }
  func.func @transform_1(%arg0: i32, %arg1: i32) -> (i32, i32) {
    %c0_i32 = arith.constant 0 : i32
    %c0_i32_0 = arith.constant 0 : i32
    %c0_i32_1 = arith.constant 0 : i32
    return %c0_i32, %c0_i32_0 : i32, i32
  }
  func.func @transform_2(%arg0: i32, %arg1: i32) -> (i32, i32) {
    %c0_i32 = arith.constant 0 : i32
    %c0_i32_0 = arith.constant 0 : i32
    %c0_i32_1 = arith.constant 0 : i32
    return %c0_i32, %c0_i32_0 : i32, i32
  }
  func.func @transform_3(%arg0: i32, %arg1: i32) -> (i32, i32) {
    %c0_i32 = arith.constant 0 : i32
    %c0_i32_0 = arith.constant 0 : i32
    %c0_i32_1 = arith.constant 0 : i32
    return %c0_i32, %c0_i32_0 : i32, i32
  }
  func.func @transform_4(%arg0: i32, %arg1: i32) -> (i32, i32) {
    %c0_i32 = arith.constant 0 : i32
    %c0_i32_0 = arith.constant 0 : i32
    %c0_i32_1 = arith.constant 0 : i32
    return %c0_i32, %c0_i32_0 : i32, i32
  }
  func.func @transform_5(%arg0: i32, %arg1: i32) -> (i32, i32) {
    %c0_i32 = arith.constant 0 : i32
    %c0_i32_0 = arith.constant 0 : i32
    %c0_i32_1 = arith.constant 0 : i32
    return %c0_i32, %c0_i32_0 : i32, i32
  }
  func.func @transform_6(%arg0: i32, %arg1: i32) -> (i32, i32, i32, i32) {
    %c0_i32 = arith.constant 0 : i32
    %c0_i32_0 = arith.constant 0 : i32
    %c0_i32_1 = arith.constant 0 : i32
    return %arg0, %c0_i32, %c0_i32_0, %arg1 : i32, i32, i32, i32
  }
  func.func @transform_7(%arg0: i32, %arg1: i32) -> (i32, i32, i32, i32) {
    %c0_i32 = arith.constant 0 : i32
    %c0_i32_0 = arith.constant 0 : i32
    %c0_i32_1 = arith.constant 0 : i32
    return %arg0, %c0_i32, %arg1, %c0_i32_0 : i32, i32, i32, i32
  }
}

module attributes {stable_mosaic.version = 11 : i64} {
  func.func @_kv_projection_kernel(%arg0: i32, %arg1: i32, %arg2: memref<1x16x128xf32, #tpu.memory_space<vmem>>, %arg3: memref<1x128xf32, #tpu.memory_space<vmem>>, %arg4: memref<1x128xf32, #tpu.memory_space<vmem>>, %arg5: memref<128x128xbf16, #tpu.memory_space<vmem>>, %arg6: memref<128x128xbf16, #tpu.memory_space<vmem>>, %arg7: memref<1x128xf32, #tpu.memory_space<vmem>>, %arg8: memref<1x4x32x16xbf16, #tpu.memory_space<vmem>>, %arg9: memref<1x4x16x32xbf16, #tpu.memory_space<vmem>>) attributes {dimension_semantics = [#tpu.dimension_semantics<parallel>, #tpu.dimension_semantics<parallel>], iteration_bounds = array<i64: 2, 1>, scalar_prefetch = 0 : i64, scratch_operands = 0 : i64, tpu.core_type = #tpu.core_type<tc>, window_params = [{transform_indices = @transform_0, window_bounds = array<i64: 1, 16, 128>}, {pipeline_mode = #tpu.pipeline_mode<synchronous>, transform_indices = @transform_1, window_bounds = array<i64: 1, 128>}, {pipeline_mode = #tpu.pipeline_mode<synchronous>, transform_indices = @transform_2, window_bounds = array<i64: 1, 128>}, {pipeline_mode = #tpu.pipeline_mode<synchronous>, transform_indices = @transform_3, window_bounds = array<i64: 128, 128>}, {pipeline_mode = #tpu.pipeline_mode<synchronous>, transform_indices = @transform_4, window_bounds = array<i64: 128, 128>}, {pipeline_mode = #tpu.pipeline_mode<synchronous>, transform_indices = @transform_5, window_bounds = array<i64: 1, 128>}, {transform_indices = @transform_6, window_bounds = array<i64: 1, 4, 32, 16>}, {transform_indices = @transform_7, window_bounds = array<i64: 1, 4, 16, 32>}]} {
    %c0 = arith.constant 0 : index
    %c0_0 = arith.constant 0 : index
    %c0_1 = arith.constant 0 : index
    %0 = vector.load %arg2[%c0, %c0_0, %c0_1] : memref<1x16x128xf32, #tpu.memory_space<vmem>>, vector<1x16x128xf32>
    %1 = vector.shape_cast %0 : vector<1x16x128xf32> to vector<16x128xf32>
    %c0_2 = arith.constant 0 : index
    %c0_3 = arith.constant 0 : index
    %2 = vector.load %arg3[%c0_2, %c0_3] : memref<1x128xf32, #tpu.memory_space<vmem>>, vector<1x128xf32>
    %c0_4 = arith.constant 0 : index
    %c0_5 = arith.constant 0 : index
    %3 = vector.load %arg4[%c0_4, %c0_5] : memref<1x128xf32, #tpu.memory_space<vmem>>, vector<1x128xf32>
    %cst = arith.constant dense<0.000000e+00> : vector<16xf32>
    %4 = vector.multi_reduction <add>, %1, %cst [1] : vector<16x128xf32> to vector<16xf32>
    %5 = vector.shape_cast %4 : vector<16xf32> to vector<16x1xf32>
    %cst_6 = arith.constant 1.280000e+02 : f32
    %6 = vector.broadcast %cst_6 : f32 to vector<16x1xf32>
    %7 = arith.divf %5, %6 : vector<16x1xf32>
    %8 = vector.broadcast %7 : vector<16x1xf32> to vector<16x128xf32>
    %9 = arith.subf %1, %8 : vector<16x128xf32>
    %10 = arith.mulf %9, %9 : vector<16x128xf32>
    %cst_7 = arith.constant dense<0.000000e+00> : vector<16xf32>
    %11 = vector.multi_reduction <add>, %10, %cst_7 [1] : vector<16x128xf32> to vector<16xf32>
    %12 = vector.shape_cast %11 : vector<16xf32> to vector<16x1xf32>
    %cst_8 = arith.constant 1.280000e+02 : f32
    %13 = vector.broadcast %cst_8 : f32 to vector<16x1xf32>
    %14 = arith.divf %12, %13 : vector<16x1xf32>
    %15 = vector.broadcast %7 : vector<16x1xf32> to vector<16x128xf32>
    %16 = arith.subf %1, %15 : vector<16x128xf32>
    %cst_9 = arith.constant 9.99999974E-6 : f32
    %17 = vector.broadcast %cst_9 : f32 to vector<16x1xf32>
    %18 = arith.addf %14, %17 : vector<16x1xf32>
    %19 = math.rsqrt %18 : vector<16x1xf32>
    %20 = vector.broadcast %19 : vector<16x1xf32> to vector<16x128xf32>
    %21 = arith.mulf %16, %20 : vector<16x128xf32>
    %22 = vector.broadcast %2 : vector<1x128xf32> to vector<16x128xf32>
    %23 = arith.mulf %21, %22 : vector<16x128xf32>
    %24 = vector.broadcast %3 : vector<1x128xf32> to vector<16x128xf32>
    %25 = arith.addf %23, %24 : vector<16x128xf32>
    %26 = arith.truncf %25 : vector<16x128xf32> to vector<16x128xbf16>
    %c0_10 = arith.constant 0 : index
    %c0_11 = arith.constant 0 : index
    %27 = vector.load %arg5[%c0_10, %c0_11] : memref<128x128xbf16, #tpu.memory_space<vmem>>, vector<128x128xbf16>
    %cst_12 = arith.constant dense<0.000000e+00> : vector<16x128xf32>
    %28 = tpu.matmul %26, %27, %cst_12 {dimension_numbers = #tpu.dot_dimension_numbers<[1], [0], [0], [1], [0, 0, 1, 1], [], []>} : vector<16x128xbf16>, vector<128x128xbf16>, vector<16x128xf32> -> vector<16x128xf32>
    %c0_13 = arith.constant 0 : index
    %c0_14 = arith.constant 0 : index
    %29 = vector.load %arg6[%c0_13, %c0_14] : memref<128x128xbf16, #tpu.memory_space<vmem>>, vector<128x128xbf16>
    %cst_15 = arith.constant dense<0.000000e+00> : vector<16x128xf32>
    %30 = tpu.matmul %26, %29, %cst_15 {dimension_numbers = #tpu.dot_dimension_numbers<[1], [0], [0], [1], [0, 0, 1, 1], [], []>} : vector<16x128xbf16>, vector<128x128xbf16>, vector<16x128xf32> -> vector<16x128xf32>
    %c0_16 = arith.constant 0 : index
    %c0_17 = arith.constant 0 : index
    %31 = vector.load %arg7[%c0_16, %c0_17] : memref<1x128xf32, #tpu.memory_space<vmem>>, vector<1x128xf32>
    %32 = vector.broadcast %31 : vector<1x128xf32> to vector<16x128xf32>
    %33 = arith.addf %30, %32 : vector<16x128xf32>
    %34 = vector.extract_strided_slice %28 {offsets = [0, 0], sizes = [16, 32], strides = [1, 1]} : vector<16x128xf32> to vector<16x32xf32>
    %35 = tpu.transpose %34, [1, 0] : vector<16x32xf32> -> vector<32x16xf32>
    %36 = arith.truncf %35 : vector<32x16xf32> to vector<32x16xbf16>
    %c0_18 = arith.constant 0 : index
    %c0_19 = arith.constant 0 : index
    %c0_20 = arith.constant 0 : index
    %c0_21 = arith.constant 0 : index
    %37 = vector.load %arg8[%c0_18, %c0_19, %c0_20, %c0_21] : memref<1x4x32x16xbf16, #tpu.memory_space<vmem>>, vector<1x1x32x16xbf16>
    %38 = vector.shape_cast %37 : vector<1x1x32x16xbf16> to vector<32x16xbf16>
    %39 = vector.shape_cast %36 : vector<32x16xbf16> to vector<1x1x32x16xbf16>
    tpu.vector_store %arg8[%c0_18, %c0_19, %c0_20, %c0_21], %39 {strides = array<i32>} : memref<1x4x32x16xbf16, #tpu.memory_space<vmem>>, vector<1x1x32x16xbf16>,
    %40 = vector.extract_strided_slice %33 {offsets = [0, 0], sizes = [16, 32], strides = [1, 1]} : vector<16x128xf32> to vector<16x32xf32>
    %41 = arith.truncf %40 : vector<16x32xf32> to vector<16x32xbf16>
    %c0_22 = arith.constant 0 : index
    %c0_23 = arith.constant 0 : index
    %c0_24 = arith.constant 0 : index
    %c0_25 = arith.constant 0 : index
    %42 = vector.load %arg9[%c0_22, %c0_23, %c0_24, %c0_25] : memref<1x4x16x32xbf16, #tpu.memory_space<vmem>>, vector<1x1x16x32xbf16>
    %43 = vector.shape_cast %42 : vector<1x1x16x32xbf16> to vector<16x32xbf16>
    %44 = vector.shape_cast %41 : vector<16x32xbf16> to vector<1x1x16x32xbf16>
    tpu.vector_store %arg9[%c0_22, %c0_23, %c0_24, %c0_25], %44 {strides = array<i32>} : memref<1x4x16x32xbf16, #tpu.memory_space<vmem>>, vector<1x1x16x32xbf16>,
    %45 = vector.extract_strided_slice %28 {offsets = [0, 32], sizes = [16, 32], strides = [1, 1]} : vector<16x128xf32> to vector<16x32xf32>
    %46 = tpu.transpose %45, [1, 0] : vector<16x32xf32> -> vector<32x16xf32>
    %47 = arith.truncf %46 : vector<32x16xf32> to vector<32x16xbf16>
    %c0_26 = arith.constant 0 : index
    %c1 = arith.constant 1 : index
    %c0_27 = arith.constant 0 : index
    %c0_28 = arith.constant 0 : index
    %48 = vector.load %arg8[%c0_26, %c1, %c0_27, %c0_28] : memref<1x4x32x16xbf16, #tpu.memory_space<vmem>>, vector<1x1x32x16xbf16>
    %49 = vector.shape_cast %48 : vector<1x1x32x16xbf16> to vector<32x16xbf16>
    %50 = vector.shape_cast %47 : vector<32x16xbf16> to vector<1x1x32x16xbf16>
    tpu.vector_store %arg8[%c0_26, %c1, %c0_27, %c0_28], %50 {strides = array<i32>} : memref<1x4x32x16xbf16, #tpu.memory_space<vmem>>, vector<1x1x32x16xbf16>,
    %51 = vector.extract_strided_slice %33 {offsets = [0, 32], sizes = [16, 32], strides = [1, 1]} : vector<16x128xf32> to vector<16x32xf32>
    %52 = arith.truncf %51 : vector<16x32xf32> to vector<16x32xbf16>
    %c0_29 = arith.constant 0 : index
    %c1_30 = arith.constant 1 : index
    %c0_31 = arith.constant 0 : index
    %c0_32 = arith.constant 0 : index
    %53 = vector.load %arg9[%c0_29, %c1_30, %c0_31, %c0_32] : memref<1x4x16x32xbf16, #tpu.memory_space<vmem>>, vector<1x1x16x32xbf16>
    %54 = vector.shape_cast %53 : vector<1x1x16x32xbf16> to vector<16x32xbf16>
    %55 = vector.shape_cast %52 : vector<16x32xbf16> to vector<1x1x16x32xbf16>
    tpu.vector_store %arg9[%c0_29, %c1_30, %c0_31, %c0_32], %55 {strides = array<i32>} : memref<1x4x16x32xbf16, #tpu.memory_space<vmem>>, vector<1x1x16x32xbf16>,
    %56 = vector.extract_strided_slice %28 {offsets = [0, 64], sizes = [16, 32], strides = [1, 1]} : vector<16x128xf32> to vector<16x32xf32>
    %57 = tpu.transpose %56, [1, 0] : vector<16x32xf32> -> vector<32x16xf32>
    %58 = arith.truncf %57 : vector<32x16xf32> to vector<32x16xbf16>
    %c0_33 = arith.constant 0 : index
    %c2 = arith.constant 2 : index
    %c0_34 = arith.constant 0 : index
    %c0_35 = arith.constant 0 : index
    %59 = vector.load %arg8[%c0_33, %c2, %c0_34, %c0_35] : memref<1x4x32x16xbf16, #tpu.memory_space<vmem>>, vector<1x1x32x16xbf16>
    %60 = vector.shape_cast %59 : vector<1x1x32x16xbf16> to vector<32x16xbf16>
    %61 = vector.shape_cast %58 : vector<32x16xbf16> to vector<1x1x32x16xbf16>
    tpu.vector_store %arg8[%c0_33, %c2, %c0_34, %c0_35], %61 {strides = array<i32>} : memref<1x4x32x16xbf16, #tpu.memory_space<vmem>>, vector<1x1x32x16xbf16>,
    %62 = vector.extract_strided_slice %33 {offsets = [0, 64], sizes = [16, 32], strides = [1, 1]} : vector<16x128xf32> to vector<16x32xf32>
    %63 = arith.truncf %62 : vector<16x32xf32> to vector<16x32xbf16>
    %c0_36 = arith.constant 0 : index
    %c2_37 = arith.constant 2 : index
    %c0_38 = arith.constant 0 : index
    %c0_39 = arith.constant 0 : index
    %64 = vector.load %arg9[%c0_36, %c2_37, %c0_38, %c0_39] : memref<1x4x16x32xbf16, #tpu.memory_space<vmem>>, vector<1x1x16x32xbf16>
    %65 = vector.shape_cast %64 : vector<1x1x16x32xbf16> to vector<16x32xbf16>
    %66 = vector.shape_cast %63 : vector<16x32xbf16> to vector<1x1x16x32xbf16>
    tpu.vector_store %arg9[%c0_36, %c2_37, %c0_38, %c0_39], %66 {strides = array<i32>} : memref<1x4x16x32xbf16, #tpu.memory_space<vmem>>, vector<1x1x16x32xbf16>,
    %67 = vector.extract_strided_slice %28 {offsets = [0, 96], sizes = [16, 32], strides = [1, 1]} : vector<16x128xf32> to vector<16x32xf32>
    %68 = tpu.transpose %67, [1, 0] : vector<16x32xf32> -> vector<32x16xf32>
    %69 = arith.truncf %68 : vector<32x16xf32> to vector<32x16xbf16>
    %c0_40 = arith.constant 0 : index
    %c3 = arith.constant 3 : index
    %c0_41 = arith.constant 0 : index
    %c0_42 = arith.constant 0 : index
    %70 = vector.load %arg8[%c0_40, %c3, %c0_41, %c0_42] : memref<1x4x32x16xbf16, #tpu.memory_space<vmem>>, vector<1x1x32x16xbf16>
    %71 = vector.shape_cast %70 : vector<1x1x32x16xbf16> to vector<32x16xbf16>
    %72 = vector.shape_cast %69 : vector<32x16xbf16> to vector<1x1x32x16xbf16>
    tpu.vector_store %arg8[%c0_40, %c3, %c0_41, %c0_42], %72 {strides = array<i32>} : memref<1x4x32x16xbf16, #tpu.memory_space<vmem>>, vector<1x1x32x16xbf16>,
    %73 = vector.extract_strided_slice %33 {offsets = [0, 96], sizes = [16, 32], strides = [1, 1]} : vector<16x128xf32> to vector<16x32xf32>
    %74 = arith.truncf %73 : vector<16x32xf32> to vector<16x32xbf16>
    %c0_43 = arith.constant 0 : index
    %c3_44 = arith.constant 3 : index
    %c0_45 = arith.constant 0 : index
    %c0_46 = arith.constant 0 : index
    %75 = vector.load %arg9[%c0_43, %c3_44, %c0_45, %c0_46] : memref<1x4x16x32xbf16, #tpu.memory_space<vmem>>, vector<1x1x16x32xbf16>
    %76 = vector.shape_cast %75 : vector<1x1x16x32xbf16> to vector<16x32xbf16>
    %77 = vector.shape_cast %74 : vector<16x32xbf16> to vector<1x1x16x32xbf16>
    tpu.vector_store %arg9[%c0_43, %c3_44, %c0_45, %c0_46], %77 {strides = array<i32>} : memref<1x4x16x32xbf16, #tpu.memory_space<vmem>>, vector<1x1x16x32xbf16>,
    return
  }
  func.func @transform_0(%arg0: i32, %arg1: i32) -> (i32, i32, i32) {
    %c0_i32 = arith.constant 0 : i32
    %c0_i32_0 = arith.constant 0 : i32
    return %arg0, %arg1, %c0_i32 : i32, i32, i32
  }
  func.func @transform_1(%arg0: i32, %arg1: i32) -> (i32, i32) {
    %c0_i32 = arith.constant 0 : i32
    %c0_i32_0 = arith.constant 0 : i32
    %c0_i32_1 = arith.constant 0 : i32
    return %c0_i32, %c0_i32_0 : i32, i32
  }
  func.func @transform_2(%arg0: i32, %arg1: i32) -> (i32, i32) {
    %c0_i32 = arith.constant 0 : i32
    %c0_i32_0 = arith.constant 0 : i32
    %c0_i32_1 = arith.constant 0 : i32
    return %c0_i32, %c0_i32_0 : i32, i32
  }
  func.func @transform_3(%arg0: i32, %arg1: i32) -> (i32, i32) {
    %c0_i32 = arith.constant 0 : i32
    %c0_i32_0 = arith.constant 0 : i32
    %c0_i32_1 = arith.constant 0 : i32
    return %c0_i32, %c0_i32_0 : i32, i32
  }
  func.func @transform_4(%arg0: i32, %arg1: i32) -> (i32, i32) {
    %c0_i32 = arith.constant 0 : i32
    %c0_i32_0 = arith.constant 0 : i32
    %c0_i32_1 = arith.constant 0 : i32
    return %c0_i32, %c0_i32_0 : i32, i32
  }
  func.func @transform_5(%arg0: i32, %arg1: i32) -> (i32, i32) {
    %c0_i32 = arith.constant 0 : i32
    %c0_i32_0 = arith.constant 0 : i32
    %c0_i32_1 = arith.constant 0 : i32
    return %c0_i32, %c0_i32_0 : i32, i32
  }
  func.func @transform_6(%arg0: i32, %arg1: i32) -> (i32, i32, i32, i32) {
    %c0_i32 = arith.constant 0 : i32
    %c0_i32_0 = arith.constant 0 : i32
    %c0_i32_1 = arith.constant 0 : i32
    return %arg0, %c0_i32, %c0_i32_0, %arg1 : i32, i32, i32, i32
  }
  func.func @transform_7(%arg0: i32, %arg1: i32) -> (i32, i32, i32, i32) {
    %c0_i32 = arith.constant 0 : i32
    %c0_i32_0 = arith.constant 0 : i32
    %c0_i32_1 = arith.constant 0 : i32
    return %arg0, %c0_i32, %arg1, %c0_i32_0 : i32, i32, i32, i32
  }
}

</mosaic_0001>

<bundles_post_ra>
// kernel: tpu_custom_call.1
= control target key start
LH: loop header
LB: loop body
LE: loop exit
PB: predicated region body
PF: predicated region fallthrough
CT: control target
= control target key end

     0   :  { %s1859_s0 = inlined_call_operand.hbm [shape: f32[2,16,128], index: 0, kind: input, shape index: {}]   ;;  %s1860_s1 = inlined_call_operand.vmem [shape: f32[1,128], index: 1, kind: input, shape index: {}]   ;;  %s1861_s2 = inlined_call_operand.vmem [shape: f32[1,128], index: 2, kind: input, shape index: {}]   ;;  %s1862_s3 = inlined_call_operand.hbm [shape: bf16[128,128], index: 3, kind: input, shape index: {}]   ;;  %s1863_s4 = inlined_call_operand.hbm [shape: bf16[128,128], index: 4, kind: input, shape index: {}]   ;;  %s1864_s5 = inlined_call_operand.vmem [shape: f32[1,128], index: 5, kind: input, shape index: {}]   ;;  %s1865_s6 = inlined_call_operand.vmem [shape: bf16[2,4,32,16], index: 6, kind: output, shape index: {0}]   ;;  %s1866_s7 = inlined_call_operand.hbm [shape: bf16[2,4,16,32], index: 7, kind: output, shape index: {1}]  }
   0x1   :  { %1871 = sst [smem:[#allocation13_spill]] %s1862_s3 }
   0x2   :  { %1872 = sst [smem:[#allocation14_spill]] %s1863_s4 }
   0x3   :  { %13 = vsyncpa [#allocation3], 0 }
   0x4   :  { %15 = vsyncpa [#allocation3 + $0x1], 0 }
   0x5   :  { %16 = vsyncpa [#allocation6], 0 }
   0x6   :  { %17 = vsyncpa [#allocation4], 0 }
   0x7   :  { %19 = vsyncpa [#allocation4 + $0x1], 0  ;;  %s1595_s24 = smov 0   ;;  %s1597_s25 = smov 0  }
   0x8   :  { %s1599_s26 = smov 0   ;;  %s1601_s27 = smov 0  }
   0x9   :  { %s1603_s28 = smov 0   ;;  %s1605_s29 = smov 0  }
   0xa LB: > { %s1068_s30 = sadd.s32 4294967295, %s1539_s29   ;;  %s1069_s8 = sadd.s32 4294967294, %s1539_s29   ;;  %s1539_s29 = sphi %s1605_s29, %s25_s29   ;;  %s1535_s28 = sphi %s1603_s28, %s1893_s28   ;;  %s1531_s27 = sphi %s1601_s27, %s1892_s27   ;;  %s1527_s26 = sphi %s1599_s26, %s1891_s26   ;;  %s1523_s25 = sphi %s1597_s25, %s1890_s25   ;;  %s1519_s24 = sphi %s1595_s24, %s1889_s24  }
   0xb   : > { %p59_p0 = scmp.ne.s32.totalorder %s1523_s25, %s1519_s24  ;;  %p1629_p1 = scmp.eq.s32.totalorder %s1068_s30, 0 }
   0xc   : > { %p1633_p2 = scmp.eq.s32.totalorder %s1068_s30, 1  ;;  %p224_p3 = scmp.eq.s32.totalorder %s1069_s8, 1 }
   0xd   : > { %s1873_s9 = scalar_select %p1629_p1, 1, 0 }
   0xe   : > { %p1639_p4 = por %p1629_p1, %p59_p0  ;;  %p1070_p5 = scmp.ge.s32.totalorder %s1539_s29, 1 }
   0xf   : > { %p1644_p6 = por %p224_p3, %p59_p0  ;;  %p231_p7 = scmp.lt.s32.totalorder %s1539_s29, 3 }
  0x10   : > { %s1875_s11 = scalar_select %p1639_p4, 1, 0 }
  0x11   : > { %s1876_s12 = scalar_select %p1644_p6, 1, 0 }
  0x12   : > { %p1649_p8 = pnand %p1070_p5, %p231_p7  ;;  %s1541_s14 = smov [#allocation5]  }
  0x13   : > { %s249_s15 = sshll.u32 %s1541_s14, 4  ;;  %s1542_s17 = smov [#allocation7]   ;;  %s250_s15 = int_to_ptr.vmem [resolvable:$true] %s249_s15 }
  0x14   : > { %p1235_p9 = pneg %p1649_p8  ;;  %s262_s18 = sshll.u32 %s1542_s17, 4  ;;  %s263_s18 = int_to_ptr.vmem [resolvable:$true] %s262_s18 }
  0x15   : > { %s1386_s19 = scalar_lea.vmem %s250_s15, 1024  ;;  %p1394_p5 = scmp.lt.s32.totalorder %s250_s15, %s250_s15 }
  0x16   : > { %p1658_p11 = pnand %p1235_p9, %p1629_p1  ;;  %p1387_p13 = scmp.ne.s32.totalorder %s250_s15, %s1386_s19 }
  0x17   : > { %p1395_p7 = scmp.lt.s32.totalorder %s1386_s19, %s1386_s19 }
  0x18   : > { %p1377_p12 = pneg %p1658_p11 }
  0x19   : > { %p1396_p10 = por %p1395_p7, %p1394_p5 }
  0x1a   : > { %p1389_p0 = pnand %p1387_p13, %p1377_p12 }
  0x1c   : > { %p1390_p3 = pneg %p1389_p0 }
  0x1e   : > { %p1397_p9 = pnand %p1396_p10, %p1390_p3 }
  0x20   : > { %1400 = shalt.err (!%p1397_p9)
}
  0x21   : > { %s1543_s20 = smov 64   ;;  %s1544_s21 = smov 4  }
  0x22   : > { %s1879_s3 = sld [smem:[#allocation13_spill]]  ;;  %s1412_s30 = scalar_lea.vmem %s263_s18, 1024 }
  0x23   : > { %p1413_p6 = scmp.ne.s32.totalorder %s263_s18, %s1412_s30  ;;  %p1420_p1 = scmp.lt.s32.totalorder %s263_s18, %s263_s18 }
  0x24   : > { %p1421_p4 = scmp.lt.s32.totalorder %s1412_s30, %s1412_s30 }
  0x25   : > { %p1415_p13 = pnand %p1413_p6, %p1377_p12 }
  0x26   : > { %p1422_p5 = por %p1421_p4, %p1420_p1 }
  0x27   : > { %p1416_p0 = pneg %p1415_p13 }
  0x28   : > { %1238 = dma.hbm_to_vmem [thread:$0]  (!%p1658_p11), %s1879_s3, 1024, %s250_s15, [#allocation6], %s1543_s20, %s1543_s20, %s1544_s21  }
  0x29   : > { %p1423_p10 = pnand %p1422_p5, %p1416_p0 }
  0x2b   : > { %1426 = shalt.err (!%p1423_p10)
}
  0x2c   : > { %s1880_s4 = sld [smem:[#allocation14_spill]]  ;;  %s37_s15 = sadd.s32 1, %s1535_s28 }
  0x2d   : > { %s46_s17 = sadd.s32 1, %s1527_s26  ;;  %p39_p1 = scmp.ge.s32.totalorder %s37_s15, 2 }
  0x2e   : > { %p53_p4 = scmp.ne.s32.totalorder %s1527_s26, %s1523_s25  ;;  %p54_p6 = scmp.eq.s32.totalorder %s1539_s29, 0 }
  0x2f   : > { %p1252_p12 = scmp.lt.s32.totalorder %s1539_s29, 2  ;;  %s1895_s15 = smov (%p39_p1, %s37_s15), 0 }
  0x30   : > { %1881 = sst [smem:[#allocation12_spill]] %s1895_s15  ;;  %p55_p3 = por %p54_p6, %p53_p4 }
  0x31   : > { %p1690_p7 = por %p1633_p2, %p53_p4  ;;  %s41_s19 = ssub.s32 %s1535_s28, %s1895_s15 }
  0x32   : > { %1241 = dma.hbm_to_vmem [thread:$0]  (!%p1658_p11), %s1880_s4, 1024, %s263_s18, [#allocation6], %s1543_s20, %s1543_s20, %s1544_s21  }
  0x33   : > { %s279_s22 = sand.u32 1, %s1527_s26   ;;  %p44_p9 = scmp.eq.s32.totalorder %s41_s19, 0 }
  0x34   : > { %s1074_s18 = sshll.u32 %s279_s22, 4  ;;  %s1144_s20 = sshll.u32 %s1535_s28, 8 }
  0x35   : > { %s1699_s21 = scalar_select %p44_p9, %s1527_s26, %s46_s17  }
  0x36   : > { %s291_s8 = scalar_lea.hbm %s1859_s0, %s1144_s20  ;;  %s283_s14 = scalar_lea.vmem [#allocation2], %s1074_s18 }
  0x37   : > { %s292_s3 = sshll.u32 %s283_s14, 4  ;;  %p1706_p11 = pnand %p1252_p12, %p55_p3  ;;  %s293_s3 = int_to_ptr.vmem [resolvable:$true] %s292_s3 }
  0x38   : > { %s280_s4 = scalar_lea.sflag [#allocation3], %s279_s22  ;;  %s1440_s19 = scalar_lea.vmem %s293_s3, 256 }
  0x39   : > { %p1429_p2 = pneg %p1706_p11  ;;  %p1441_p13 = scmp.ne.s32.totalorder %s293_s3, %s1440_s19 }
  0x3a   : > { %s1545_s17 = smov [#allocation2]  }
  0x3b   : > { %p1443_p0 = pnand %p1441_p13, %p1429_p2  ;;  %s1445_s15 = sshll.u32 %s1545_s17, 4  ;;  %s1446_s15 = int_to_ptr.vmem [resolvable:$false] %s1445_s15 }
  0x3c   : > { %s1447_s20 = scalar_lea.vmem %s1446_s15, 512  ;;  %p1448_p10 = scmp.lt.s32.totalorder %s293_s3, %s1446_s15 }
  0x3d   : > { %p1444_p5 = pneg %p1443_p0  ;;  %p1449_p1 = scmp.lt.s32.totalorder %s1447_s20, %s1440_s19 }
  0x3f   : > { %p1450_p4 = por %p1449_p1, %p1448_p10 }
  0x41   : > { %p1451_p6 = pnand %p1450_p4, %p1444_p5 }
  0x43   : > { %1454 = shalt.err (!%p1451_p6)
}
  0x44   : > { %s1546_s18 = smov 128   ;;  %s1547_s23 = smov 8  }
  0x45   : > { %1245 = dma.hbm_to_vmem [thread:$0]  (!%p1706_p11), %s291_s8, 256, %s293_s3, %s280_s4, %s1546_s18, %s1546_s18, %s1547_s23  }
  0x46   : > { %304 = sbr.rel (%p1649_p8) target bundleno = 891 (0x37b), region = 44  ;;  %s1717_s22 = sand.u32 (!%p1649_p8), 1, %s1523_s25  }
  0x47   : > { %s1078_s30 = sshll.u32 (!%p1649_p8), %s1717_s22, 4  ;;  %s307_s15 = scalar_lea.sflag (!%p1649_p8), [#allocation3], %s1717_s22 }
  0x48   : > { %s310_s14 = scalar_lea.vmem (!%p1649_p8), [#allocation2], %s1078_s30  ;;  %p1884_p12 = scmp.ne.s32.totalorder (!%p1649_p8), %s1875_s11, 0 }
  0x4b   : > { %1506 = dma.done.wait (%p1884_p12), %s307_s15, 256  }
  0x4c   : > { %1508 = vsyncadd (%p1884_p12), %s307_s15, 4294967040  ;;  %p1885_p3 = scmp.ne.s32.totalorder %s1873_s9, 0 }
  0x4e   : > { %1510 = dma.done.wait (%p1885_p3), [#allocation6], 2048  }
  0x4f   : > { %1512 = vsyncadd (%p1885_p3), [#allocation6], 4294965248  ;;  %v368_v0 = vld [vmem:[%s310_s14] sm:$0xff]  ;;  %v369_v1 = vld [vmem:[%s310_s14 + $0x8] sm:$0xff]  ;;  %v1548_v4 = vmov 0.0   ;;  %vm1549_vm0 = vmmov 0  }
  0x50   : > { %372 = vadd.xlane.f32.xlu0 %v368_v0  ;;  %v1355_v2 = vld [vmem:[#allocation5 + $0x38] sm:$0xff]   ;;  %1183 = vmatprep.subr.bf16.mxu0 %v1548_v4  ;;  %v1357_v13 = vld [vmem:[#allocation5 + $0x30] sm:$0xff]   ;;  %v1359_v15 = vld [vmem:[#allocation5 + $0x28] sm:$0xff]   ;;  %s1081_s10 = sshll.u32 %s1717_s22, 5  ;;  %vm690_vm1 = vcmask 257024   ;;  %s1550_s17 = smov 96  }
  0x51   : > { %v1356_v3 = vld [vmem:[#allocation7 + $0x38] sm:$0xff]   ;;  %1203 = vmatprep.subr.bf16.mxu1 %v1548_v4  ;;  %1184 = vmatpush3.bf16.msra.mxu0 %v1355_v2  ;;  %v1358_v14 = vld [vmem:[#allocation7 + $0x30] sm:$0xff]   ;;  %v1360_v16 = vld [vmem:[#allocation7 + $0x28] sm:$0xff]   ;;  %s1739_s19 = scalar_lea.vmem [#allocation8], %s1081_s10  ;;  %s1551_s20 = smov 32   ;;  %vm677_vm2 = vcmask 125952  }
  0x52   : > { %1204 = vmatpush3.bf16.msra.mxu1 %v1356_v3  ;;  %1185 = vmatprep.subr.bf16.mxu0 %v1548_v4  ;;  %v1361_v17 = vld [vmem:[#allocation5 + $0x20] sm:$0xff]   ;;  %v1363_v19 = vld [vmem:[#allocation5 + $0x18] sm:$0xff]   ;;  %v1365_v21 = vld [vmem:[#allocation5 + $0x10] sm:$0xff]   ;;  %s1552_s18 = smov 64   ;;  %p358_p8 = scmp.lt.s32.totalorder %s1531_s27, 1 }
  0x53   : > { %1205 = vmatprep.subr.bf16.mxu1 %v1548_v4  ;;  %v1362_v18 = vld [vmem:[#allocation7 + $0x20] sm:$0xff]   ;;  %1199 = vmatprep.mubr.msk.bf16.mxu0 %vm1549_vm0, %v1548_v4  ;;  %v1364_v20 = vld [vmem:[#allocation7 + $0x18] sm:$0xff]   ;;  %v1366_v22 = vld [vmem:[#allocation7 + $0x10] sm:$0xff]   ;;  %s1164_s4 = sshll.u32 %s1531_s27, 9  ;;  %s926_s9 = sshll.u32 %s1739_s19, 4  ;;  %s1807_s9 = int_to_ptr.vmem [resolvable:$true] %s926_s9 }
  0x54   : > { %374 = vadd.xlane.f32.xlu0 %v369_v1  ;;  %1219 = vmatprep.mubr.msk.bf16.mxu1 %vm1549_vm0, %v1548_v4  ;;  %v1367_v23 = vld [vmem:[#allocation5 + $0x8] sm:$0xff]   ;;  %v1369_v25 = vld [vmem:[#allocation5] sm:$0xff]   ;;  %s359_s23 = scalar_select %p358_p8, %s1531_s27, 1 }
  0x55   : > { %1186 = vmatpush3.bf16.msra.mxu0 %v1357_v13  ;;  %v1368_v24 = vld [vmem:[#allocation7 + $0x8] sm:$0xff]   ;;  %v1370_v26 = vld [vmem:[#allocation7] sm:$0xff]   ;;  %s1805_s8 = scalar_lea.hbm %s1866_s7, %s1164_s4  ;;  %s908_s10 = scalar_lea.sflag [#allocation4], %s1717_s22 }
  0x56   : > { %1206 = vmatpush3.bf16.msra.mxu1 %v1358_v14  ;;  %1187 = vmatprep.subr.bf16.mxu0 %v1548_v4  ;;  %v1084_v35 = vld [vmem:[%s1860_s1] ss:$0 sm:$0xff]  ;;  %s1145_s30 = sshll.u32 %s359_s23, 6  ;;  %s1553_s27 = smov [#allocation8]  }
  0x57   : > { %1207 = vmatprep.subr.bf16.mxu1 %v1548_v4  ;;  %v1085_v39 = vld [vmem:[%s1861_s2] ss:$0 sm:$0xff]  ;;  %s1756_s3 = scalar_lea.vmem %s1865_s6, %s1145_s30 }
  0x58   : > { %v1094_v44 = vld [vmem:[%s1864_s5] ss:$0 sm:$0xff] }
  0x59   : > { %1188 = vmatpush3.bf16.msra.mxu0 %v1359_v15 }
  0x5a   : > { %1208 = vmatpush3.bf16.msra.mxu1 %v1360_v16  ;;  %1189 = vmatprep.subr.bf16.mxu0 %v1548_v4 }
  0x5b   : > { %1209 = vmatprep.subr.bf16.mxu1 %v1548_v4 }
  0x5d   : > { %1190 = vmatpush3.bf16.msra.mxu0 %v1361_v17 }
  0x5e   : > { %1210 = vmatpush3.bf16.msra.mxu1 %v1362_v18  ;;  %1191 = vmatprep.subr.bf16.mxu0 %v1548_v4 }
  0x5f   : > { %1211 = vmatprep.subr.bf16.mxu1 %v1548_v4 }
  0x61   : > { %1192 = vmatpush3.bf16.msra.mxu0 %v1363_v19 }
  0x62   : > { %1212 = vmatpush3.bf16.msra.mxu1 %v1364_v20  ;;  %1193 = vmatprep.subr.bf16.mxu0 %v1548_v4 }
  0x63   : > { %1213 = vmatprep.subr.bf16.mxu1 %v1548_v4 }
  0x65   : > { %1194 = vmatpush3.bf16.msra.mxu0 %v1365_v21 }
  0x66   : > { %1214 = vmatpush3.bf16.msra.mxu1 %v1366_v22  ;;  %1195 = vmatprep.subr.bf16.mxu0 %v1548_v4 }
  0x67   : > { %1215 = vmatprep.subr.bf16.mxu1 %v1548_v4 }
  0x69   : > { %1196 = vmatpush3.bf16.msra.mxu0 %v1367_v23 }
  0x6a   : > { %1216 = vmatpush3.bf16.msra.mxu1 %v1368_v24  ;;  %1197 = vmatprep.subr.bf16.mxu0 %v1548_v4 }
  0x6b   : > { %1217 = vmatprep.subr.bf16.mxu1 %v1548_v4 }
  0x6d   : > { %1198 = vmatpush3.bf16.msra.mxu0 %v1369_v25 }
  0x6e   : > { %1218 = vmatpush3.bf16.msra.mxu1 %v1370_v26 }
  0xd9   : > { %v373_v5 = vpop.xlane.xlu0 %372 }
  0xda   : > { %v377_v6 = vmul.f32 0.0078125, %v373_v5 }
  0xdc   : > { %v379_v7 = vsub.f32 %v368_v0, %v377_v6 }
  0xdd   : > { %v375_v8 = vpop.xlane.xlu0 %374 }
  0xde   : > { %v378_v9 = vmul.f32 0.0078125, %v375_v8  ;;  %v381_v10 = vmul.f32 %v379_v7, %v379_v7 }
  0xe0   : > { %v380_v11 = vsub.f32 %v369_v1, %v378_v9  ;;  %383 = vadd.xlane.f32.xlu1 %v381_v10 }
  0xe2   : > { %v382_v12 = vmul.f32 %v380_v11, %v380_v11 }
  0xe4   : > { %385 = vadd.xlane.f32.xlu1 %v382_v12 }
 0x169   : > { %v384_v27 = vpop.xlane.xlu1 %383 }
 0x16a   : > { %v387_v28 = vmul.f32 0.0078125, %v384_v27 }
 0x16c   : > { %v389_v29 = vadd.f32 1e-05, %v387_v28 }
 0x16d   : > { %v386_v30 = vpop.xlane.xlu1 %385 }
 0x16e   : > { %1371 = vrsqrt.f32 %v389_v29  ;;  %v388_v31 = vmul.f32 0.0078125, %v386_v30 }
 0x170   : > { %v390_v32 = vadd.f32 1e-05, %v388_v31 }
 0x172   : > { %1373 = vrsqrt.f32 %v390_v32 }
 0x17b   : > { %v1372_v33 = vpop.eup %1371 }
 0x17c   : > { %v393_v34 = vmul.f32 %v1372_v33, %v379_v7 }
 0x17e   : > { %v401_v38 = vmul.f32 %v1084_v35, %v393_v34 }
 0x17f   : > { %v1374_v36 = vpop.eup %1373 }
 0x180   : > { %v394_v37 = vmul.f32 %v1374_v36, %v380_v11  ;;  %v409_v41 = vadd.f32 %v1085_v39, %v401_v38 }
 0x182   : > { %v402_v40 = vmul.f32 %v1084_v35, %v394_v37 }
 0x184   : > { %v410_v42 = vadd.f32 %v1085_v39, %v402_v40 }
 0x186   : > { %v411_v43 = vpack.c.bf16 %v410_v42, %v409_v41 }
 0x188   : > { %1200 = vmatmul.mubr.bf16.vlgmr.msra.gmra.mxu0 %v411_v43  ;;  %1220 = vmatmul.mubr.bf16.vlgmr.msra.gmra.mxu1 %v411_v43 }
 0x248   : > { %v510_v45 = vpop.f32.mrf.mxu0  ;;  %v622_v46 = vpop.f32.mrf.mxu1 }
 0x249   : > { %v623_v47 = vadd.f32 %v1094_v44, %v622_v46 }
 0x24a   : > { %v1201_v48 = vpop.f32.mrf.mxu0  ;;  %v1221_v49 = vpop.f32.mrf.mxu1 }
 0x24b   : > { %v1150_v50 = vpack.c.bf16 %v623_v47, %v623_v47 }
 0x24c   : > { %v513_v51 = vpop.f32.mrf.mxu0  ;;  %v625_v52 = vpop.f32.mrf.mxu1 }
 0x24d   : > { %691 = vst.msk [vmem:[%s1739_s19] sm:$0xf] %vm690_vm1, %v1150_v50  ;;  %v626_v53 = vadd.f32 %v1094_v44, %v625_v52  ;;  %754 = vrot.lane.b32.xlu0 %v1150_v50, %s1550_s17  ;;  %v1316_v54 = vpack.i.bf16 %v513_v51, %v510_v45 }
 0x24e   : > { %v1202_v55 = vpop.f32.mrf.mxu0  ;;  %v1222_v56 = vpop.f32.mrf.mxu1 }
 0x24f   : > { %v1151_v57 = vpack.c.bf16 %v626_v53, %v626_v53  ;;  %1317 = vrot.lane.b32.xlu1 %v1316_v54, %s1550_s17 }
 0x251   : > { %692 = vst.msk [vmem:[%s1739_s19 + $0x4] sm:$0xf] %vm690_vm1, %v1151_v57  ;;  %1327 = vrot.lane.b32.xlu0 %v1316_v54, %s1551_s20 }
 0x253   : > { %1322 = vrot.lane.b32.xlu1 %v1316_v54, %s1552_s18 }
 0x257   : > { %756 = vrot.lane.b32.xlu1 %v1151_v57, %s1550_s17  ;;  %s1455_s17 = scalar_lea.vmem %s1807_s9, 512 }
 0x258   : > { %p1456_p9 = scmp.ne.s32.totalorder %s1807_s9, %s1455_s17 }
 0x25a   : > { %p1457_p11 = pnand %p1456_p9, %p1690_p7 }
 0x25c   : > { %p1458_p2 = pneg %p1457_p11 }
 0x26f   : > { %629 = vxpose.xlu0.b32.start [1/2] (short) (narrow) %v510_v45, 32 }
 0x273   : > { %630 = vxpose.xlu0.b32.end [2/2] (short) (narrow) %v513_v51, 32 }
 0x2bf   : > { %v755_v58 = vpop.permute.xlu0 %754 }
 0x2c0   : > { %1117 = vst.msk [vmem:[%s1739_s19 + $0x8] sm:$0xf] %vm690_vm1, %v755_v58 }
 0x2c1   : > { %v1318_v59 = vpop.permute.xlu1 %1317 }
 0x2c2   : > { %v1319_v60 = vunpack.i.l.bf16 %v1318_v59  ;;  %v1320_v63 = vunpack.i.h.bf16 %v1318_v59 }
 0x2c3   : > { %v1328_v61 = vpop.permute.xlu0 %1327 }
 0x2c4   : > { %701 = vxpose.xlu1.b32.start [1/2] (short) (narrow) %v1319_v60, 32  ;;  %v1329_v0 = vunpack.i.l.bf16 %v1328_v61  ;;  %v1330_v5 = vunpack.i.h.bf16 %v1328_v61 }
 0x2c5   : > { %v1323_v62 = vpop.permute.xlu1 %1322 }
 0x2c6   : > { %v1324_v1 = vunpack.i.l.bf16 %v1323_v62  ;;  %v1325_v2 = vunpack.i.h.bf16 %v1323_v62 }
 0x2c8   : > { %702 = vxpose.xlu1.b32.end [2/2] (short) (narrow) %v1320_v63, 32  ;;  %v1331_v3 = vpack.i.bf16 %v1329_v0, %v1324_v1  ;;  %v1333_v6 = vpack.i.bf16 %v1330_v5, %v1325_v2 }
 0x2c9   : > { %v757_v4 = vpop.permute.xlu1 %756 }
 0x2ca   : > { %1118 = vst.msk [vmem:[%s1739_s19 + $0xc] sm:$0xf] %vm690_vm1, %v757_v4  ;;  %1332 = vxpose.xlu0.b32.start [1/2] (short) (narrow) %v1331_v3, 32 }
 0x2ce   : > { %1334 = vxpose.xlu0.b32.end [2/2] (short) (narrow) %v1333_v6, 32 }
 0x2eb   : > { %v645_v7 = vpop.trf.xlu0 }
 0x2ec   : > { %v1146_v8 = vpack.c.bf16 %v645_v7, %v645_v7 }
 0x2ee   : > { %822 = vrot.lane.b32.xlu1 %v1150_v50, %s1552_s18  ;;  %678 = vst.msk [vmem:[%s1756_s3] sm:$0xf] %vm677_vm2, %v1146_v8 }
 0x2ef   : > { %v646_v9 = vpop.trf.xlu0 }
 0x2f0   : > { %v1147_v10 = vpack.c.bf16 %v646_v9, %v646_v9 }
 0x2f2   : > { %824 = vrot.lane.b32.xlu1 %v1151_v57, %s1552_s18  ;;  %679 = vst.msk [vmem:[%s1756_s3 + $0x4] sm:$0xf] %vm677_vm2, %v1147_v10 }
 0x2f3   : > { %v647_v11 = vpop.trf.xlu0 }
 0x2f4   : > { %v1148_v12 = vpack.c.bf16 %v647_v11, %v647_v11 }
 0x2f6   : > { %890 = vrot.lane.b32.xlu1 %v1150_v50, %s1551_s20  ;;  %680 = vst.msk [vmem:[%s1756_s3 + $0x8] sm:$0xf] %vm677_vm2, %v1148_v12 }
 0x2f7   : > { %v648_v13 = vpop.trf.xlu0 }
 0x2f8   : > { %v1149_v14 = vpack.c.bf16 %v648_v13, %v648_v13 }
 0x2fa   : > { %892 = vrot.lane.b32.xlu1 %v1151_v57, %s1551_s20  ;;  %681 = vst.msk [vmem:[%s1756_s3 + $0xc] sm:$0xf] %vm677_vm2, %v1149_v14  ;;  %s1459_s20 = sshll.u32 %s1553_s27, 4  ;;  %s1460_s20 = int_to_ptr.vmem [resolvable:$false] %s1459_s20 }
 0x2fb   : > { %s1461_s23 = scalar_lea.vmem %s1460_s20, 1024  ;;  %p1462_p13 = scmp.lt.s32.totalorder %s1807_s9, %s1460_s20 }
 0x2fc   : > { %p1463_p0 = scmp.lt.s32.totalorder %s1461_s23, %s1455_s17 }
 0x2fe   : > { %p1464_p5 = por %p1463_p0, %p1462_p13 }
 0x300   : > { %p1465_p10 = pnand %p1464_p5, %p1458_p2 }
 0x340   : > { %v717_v15 = vpop.trf.xlu1 }
 0x341   : > { %v1152_v16 = vpack.c.bf16 %v717_v15, %v717_v15 }
 0x343   : > { %1113 = vst.msk [vmem:[%s1756_s3 + $0x10] sm:$0xf] %vm677_vm2, %v1152_v16 }
 0x344   : > { %v718_v17 = vpop.trf.xlu1 }
 0x345   : > { %v1153_v18 = vpack.c.bf16 %v718_v17, %v718_v17 }
 0x346   : > { %v1335_v19 = vpop.trf.xlu0 }
 0x347   : > { %1114 = vst.msk [vmem:[%s1756_s3 + $0x14] sm:$0xf] %vm677_vm2, %v1153_v18  ;;  %v1339_v20 = vunpack.i.h.bf16 %v1335_v19  ;;  %v1336_v21 = vunpack.i.l.bf16 %v1335_v19 }
 0x348   : > { %v719_v22 = vpop.trf.xlu1 }
 0x349   : > { %v1154_v23 = vpack.c.bf16 %v719_v22, %v719_v22  ;;  %v1160_v24 = vpack.c.bf16 %v1339_v20, %v1339_v20  ;;  %v1156_v25 = vpack.c.bf16 %v1336_v21, %v1336_v21 }
 0x34a   : > { %v1340_v26 = vpop.trf.xlu0 }
 0x34b   : > { %1115 = vst.msk [vmem:[%s1756_s3 + $0x18] sm:$0xf] %vm677_vm2, %v1154_v23  ;;  %1133 = vst.msk [vmem:[%s1756_s3 + $0x30] sm:$0xf] %vm677_vm2, %v1160_v24  ;;  %v1344_v27 = vunpack.i.h.bf16 %v1340_v26  ;;  %v1341_v28 = vunpack.i.l.bf16 %v1340_v26 }
 0x34c   : > { %1123 = vst.msk [vmem:[%s1756_s3 + $0x20] sm:$0xf] %vm677_vm2, %v1156_v25  ;;  %v720_v29 = vpop.trf.xlu1 }
 0x34d   : > { %v1155_v30 = vpack.c.bf16 %v720_v29, %v720_v29  ;;  %v1161_v31 = vpack.c.bf16 %v1344_v27, %v1344_v27  ;;  %v1157_v32 = vpack.c.bf16 %v1341_v28, %v1341_v28 }
 0x34e   : > { %v1345_v33 = vpop.trf.xlu0 }
 0x34f   : > { %1116 = vst.msk [vmem:[%s1756_s3 + $0x1c] sm:$0xf] %vm677_vm2, %v1155_v30  ;;  %1134 = vst.msk [vmem:[%s1756_s3 + $0x34] sm:$0xf] %vm677_vm2, %v1161_v31  ;;  %v1349_v34 = vunpack.i.h.bf16 %v1345_v33  ;;  %v1346_v35 = vunpack.i.l.bf16 %v1345_v33 }
 0x350   : > { %1124 = vst.msk [vmem:[%s1756_s3 + $0x24] sm:$0xf] %vm677_vm2, %v1157_v32 }
 0x351   : > { %v1162_v36 = vpack.c.bf16 %v1349_v34, %v1349_v34  ;;  %v1158_v37 = vpack.c.bf16 %v1346_v35, %v1346_v35 }
 0x352   : > { %v1350_v38 = vpop.trf.xlu0 }
 0x353   : > { %1135 = vst.msk [vmem:[%s1756_s3 + $0x38] sm:$0xf] %vm677_vm2, %v1162_v36  ;;  %1125 = vst.msk [vmem:[%s1756_s3 + $0x28] sm:$0xf] %vm677_vm2, %v1158_v37  ;;  %v1354_v39 = vunpack.i.h.bf16 %v1350_v38  ;;  %v1351_v40 = vunpack.i.l.bf16 %v1350_v38 }
 0x355   : > { %v1163_v41 = vpack.c.bf16 %v1354_v39, %v1354_v39  ;;  %v1159_v42 = vpack.c.bf16 %v1351_v40, %v1351_v40 }
 0x357   : > { %1136 = vst.msk [vmem:[%s1756_s3 + $0x3c] sm:$0xf] %vm677_vm2, %v1163_v41  ;;  %1126 = vst.msk [vmem:[%s1756_s3 + $0x2c] sm:$0xf] %vm677_vm2, %v1159_v42 }
 0x360   : > { %v823_v43 = vpop.permute.xlu1 %822 }
 0x361   : > { %1127 = vst.msk [vmem:[%s1739_s19 + $0x10] sm:$0xf] %vm690_vm1, %v823_v43 }
 0x364   : > { %v825_v44 = vpop.permute.xlu1 %824 }
 0x365   : > { %1128 = vst.msk [vmem:[%s1739_s19 + $0x14] sm:$0xf] %vm690_vm1, %v825_v44 }
 0x368   : > { %v891_v45 = vpop.permute.xlu1 %890 }
 0x369   : > { %1137 = vst.msk [vmem:[%s1739_s19 + $0x18] sm:$0xf] %vm690_vm1, %v891_v45 }
 0x36c   : > { %v893_v46 = vpop.permute.xlu1 %892 }
 0x36d   : > { %1138 = vst.msk [vmem:[%s1739_s19 + $0x1c] sm:$0xf] %vm690_vm1, %v893_v46 }
 0x36e   : > { %1468 = shalt.err (!%p1465_p10)
}
 0x36f   : > { %s1469_s19 = scalar_lea.hbm %s1805_s8, 512  ;;  %s1473_s14 = scalar_lea.hbm %s1866_s7, 1024 }
 0x370   : > { %p1470_p1 = scmp.ne.s32.totalorder %s1805_s8, %s1469_s19  ;;  %p1474_p12 = scmp.lt.s32.totalorder %s1805_s8, %s1866_s7 }
 0x371   : > { %p1475_p3 = scmp.lt.s32.totalorder %s1473_s14, %s1469_s19 }
 0x372   : > { %p1471_p4 = pnand %p1470_p1, %p1690_p7 }
 0x373   : > { %p1476_p8 = por %p1475_p3, %p1474_p12 }
 0x374   : > { %p1472_p6 = pneg %p1471_p4 }
 0x376   : > { %p1477_p9 = pnand %p1476_p8, %p1472_p6 }
 0x378   : > { %1480 = shalt.err (!%p1477_p9)
}
 0x379   : > { %s1554_s11 = smov 4  }
 0x37a   : > { %1233 = dma.vmem_to_hbm [thread:$0]  (%p1690_p7), %s1807_s9, 512, %s1805_s8, %s908_s10, %s1552_s18, %s1552_s18, %s1554_s11  }
 0x37b PF: > { %s952_s13 = sand.u32 1, %s1519_s24   ;;  %p1886_p11 = scmp.ne.s32.totalorder %s1876_s12, 0 }
 0x37c   : > { %p1887_p2 = scmp.ge.s32.totalorder %s1539_s29, 2  ;;  %s953_s17 = scalar_lea.sflag [#allocation4], %s952_s13 }
 0x37e   : > { %p1247_p13 = pnand %p1887_p2, %p1886_p11 }
 0x380   : > { %p1248_p0 = pneg %p1247_p13 }
 0x382   : > { %1514 = dma.done.wait (%p1248_p0), %s953_s17, 512  }
 0x383   : > { %1516 = vsyncadd (%p1248_p0), %s953_s17, 4294966784  ;;  %s25_s29 = sadd.s32 1, %s1539_s29   ;;  %s1888_s16 = sld [smem:[#allocation12_spill]] }
 0x384   : > { %p22_p5 = scmp.ge.s32.totalorder %s25_s29, 4   ;;  %s1889_s24 = smov %s1523_s25 }
 0x385   : > { %s1890_s25 = smov %s1527_s26  ;;  %s1891_s26 = smov %s1699_s21 }
 0x386   : > { %s1892_s27 = smov %s1535_s28  ;;  %24 = sbr.rel (!%p22_p5) target bundleno = 10 (0xa), region = 115 }
 0x389   : > { %s1893_s28 = smov %s1888_s16 }
 0x38b   :  { %958 = vsyncpa [#allocation3], 1 }
 0x38c   :  { %960 = vsyncpa [#allocation3 + $0x1], 1 }
 0x38d   :  { %961 = vsyncpa [#allocation6], 1 }
 0x38e   :  { %962 = vsyncpa [#allocation4], 1 }
 0x38f   :  { %964 = vsyncpa [#allocation4 + $0x1], 1 }

// kernel: tpu_custom_call.1
= control target key start
LH: loop header
LB: loop body
LE: loop exit
PB: predicated region body
PF: predicated region fallthrough
CT: control target
= control target key end

     0   :  { %s1859_s0 = inlined_call_operand.hbm [shape: f32[2,16,128], index: 0, kind: input, shape index: {}]   ;;  %s1860_s1 = inlined_call_operand.vmem [shape: f32[1,128], index: 1, kind: input, shape index: {}]   ;;  %s1861_s2 = inlined_call_operand.vmem [shape: f32[1,128], index: 2, kind: input, shape index: {}]   ;;  %s1862_s3 = inlined_call_operand.hbm [shape: bf16[128,128], index: 3, kind: input, shape index: {}]   ;;  %s1863_s4 = inlined_call_operand.hbm [shape: bf16[128,128], index: 4, kind: input, shape index: {}]   ;;  %s1864_s5 = inlined_call_operand.vmem [shape: f32[1,128], index: 5, kind: input, shape index: {}]   ;;  %s1865_s6 = inlined_call_operand.vmem [shape: bf16[2,4,32,16], index: 6, kind: output, shape index: {0}]   ;;  %s1866_s7 = inlined_call_operand.hbm [shape: bf16[2,4,16,32], index: 7, kind: output, shape index: {1}]  }
   0x1   :  { %1871 = sst [smem:[#allocation13_spill]] %s1862_s3 }
   0x2   :  { %1872 = sst [smem:[#allocation14_spill]] %s1863_s4 }
   0x3   :  { %13 = vsyncpa [#allocation3], 0 }
   0x4   :  { %15 = vsyncpa [#allocation3 + $0x1], 0 }
   0x5   :  { %16 = vsyncpa [#allocation6], 0 }
   0x6   :  { %17 = vsyncpa [#allocation4], 0 }
   0x7   :  { %19 = vsyncpa [#allocation4 + $0x1], 0  ;;  %s1595_s24 = smov 0   ;;  %s1597_s25 = smov 0  }
   0x8   :  { %s1599_s26 = smov 0   ;;  %s1601_s27 = smov 0  }
   0x9   :  { %s1603_s28 = smov 0   ;;  %s1605_s29 = smov 0  }
   0xa LB: > { %s1068_s30 = sadd.s32 4294967295, %s1539_s29   ;;  %s1069_s8 = sadd.s32 4294967294, %s1539_s29   ;;  %s1539_s29 = sphi %s1605_s29, %s25_s29   ;;  %s1535_s28 = sphi %s1603_s28, %s1893_s28   ;;  %s1531_s27 = sphi %s1601_s27, %s1892_s27   ;;  %s1527_s26 = sphi %s1599_s26, %s1891_s26   ;;  %s1523_s25 = sphi %s1597_s25, %s1890_s25   ;;  %s1519_s24 = sphi %s1595_s24, %s1889_s24  }
   0xb   : > { %p59_p0 = scmp.ne.s32.totalorder %s1523_s25, %s1519_s24  ;;  %p1629_p1 = scmp.eq.s32.totalorder %s1068_s30, 0 }
   0xc   : > { %p1633_p2 = scmp.eq.s32.totalorder %s1068_s30, 1  ;;  %p224_p3 = scmp.eq.s32.totalorder %s1069_s8, 1 }
   0xd   : > { %s1873_s9 = scalar_select %p1629_p1, 1, 0 }
   0xe   : > { %p1639_p4 = por %p1629_p1, %p59_p0  ;;  %p1070_p5 = scmp.ge.s32.totalorder %s1539_s29, 1 }
   0xf   : > { %p1644_p6 = por %p224_p3, %p59_p0  ;;  %p231_p7 = scmp.lt.s32.totalorder %s1539_s29, 3 }
  0x10   : > { %s1875_s11 = scalar_select %p1639_p4, 1, 0 }
  0x11   : > { %s1876_s12 = scalar_select %p1644_p6, 1, 0 }
  0x12   : > { %p1649_p8 = pnand %p1070_p5, %p231_p7  ;;  %s1541_s14 = smov [#allocation5]  }
  0x13   : > { %s249_s15 = sshll.u32 %s1541_s14, 4  ;;  %s1542_s17 = smov [#allocation7]   ;;  %s250_s15 = int_to_ptr.vmem [resolvable:$true] %s249_s15 }
  0x14   : > { %p1235_p9 = pneg %p1649_p8  ;;  %s262_s18 = sshll.u32 %s1542_s17, 4  ;;  %s263_s18 = int_to_ptr.vmem [resolvable:$true] %s262_s18 }
  0x15   : > { %s1386_s19 = scalar_lea.vmem %s250_s15, 1024  ;;  %p1394_p5 = scmp.lt.s32.totalorder %s250_s15, %s250_s15 }
  0x16   : > { %p1658_p11 = pnand %p1235_p9, %p1629_p1  ;;  %p1387_p13 = scmp.ne.s32.totalorder %s250_s15, %s1386_s19 }
  0x17   : > { %p1395_p7 = scmp.lt.s32.totalorder %s1386_s19, %s1386_s19 }
  0x18   : > { %p1377_p12 = pneg %p1658_p11 }
  0x19   : > { %p1396_p10 = por %p1395_p7, %p1394_p5 }
  0x1a   : > { %p1389_p0 = pnand %p1387_p13, %p1377_p12 }
  0x1c   : > { %p1390_p3 = pneg %p1389_p0 }
  0x1e   : > { %p1397_p9 = pnand %p1396_p10, %p1390_p3 }
  0x20   : > { %1400 = shalt.err (!%p1397_p9)
}
  0x21   : > { %s1543_s20 = smov 64   ;;  %s1544_s21 = smov 4  }
  0x22   : > { %s1879_s3 = sld [smem:[#allocation13_spill]]  ;;  %s1412_s30 = scalar_lea.vmem %s263_s18, 1024 }
  0x23   : > { %p1413_p6 = scmp.ne.s32.totalorder %s263_s18, %s1412_s30  ;;  %p1420_p1 = scmp.lt.s32.totalorder %s263_s18, %s263_s18 }
  0x24   : > { %p1421_p4 = scmp.lt.s32.totalorder %s1412_s30, %s1412_s30 }
  0x25   : > { %p1415_p13 = pnand %p1413_p6, %p1377_p12 }
  0x26   : > { %p1422_p5 = por %p1421_p4, %p1420_p1 }
  0x27   : > { %p1416_p0 = pneg %p1415_p13 }
  0x28   : > { %1238 = dma.hbm_to_vmem [thread:$0]  (!%p1658_p11), %s1879_s3, 1024, %s250_s15, [#allocation6], %s1543_s20, %s1543_s20, %s1544_s21  }
  0x29   : > { %p1423_p10 = pnand %p1422_p5, %p1416_p0 }
  0x2b   : > { %1426 = shalt.err (!%p1423_p10)
}
  0x2c   : > { %s1880_s4 = sld [smem:[#allocation14_spill]]  ;;  %s37_s15 = sadd.s32 1, %s1535_s28 }
  0x2d   : > { %s46_s17 = sadd.s32 1, %s1527_s26  ;;  %p39_p1 = scmp.ge.s32.totalorder %s37_s15, 2 }
  0x2e   : > { %p53_p4 = scmp.ne.s32.totalorder %s1527_s26, %s1523_s25  ;;  %p54_p6 = scmp.eq.s32.totalorder %s1539_s29, 0 }
  0x2f   : > { %p1252_p12 = scmp.lt.s32.totalorder %s1539_s29, 2  ;;  %s1895_s15 = smov (%p39_p1, %s37_s15), 0 }
  0x30   : > { %1881 = sst [smem:[#allocation12_spill]] %s1895_s15  ;;  %p55_p3 = por %p54_p6, %p53_p4 }
  0x31   : > { %p1690_p7 = por %p1633_p2, %p53_p4  ;;  %s41_s19 = ssub.s32 %s1535_s28, %s1895_s15 }
  0x32   : > { %1241 = dma.hbm_to_vmem [thread:$0]  (!%p1658_p11), %s1880_s4, 1024, %s263_s18, [#allocation6], %s1543_s20, %s1543_s20, %s1544_s21  }
  0x33   : > { %s279_s22 = sand.u32 1, %s1527_s26   ;;  %p44_p9 = scmp.eq.s32.totalorder %s41_s19, 0 }
  0x34   : > { %s1074_s18 = sshll.u32 %s279_s22, 4  ;;  %s1144_s20 = sshll.u32 %s1535_s28, 8 }
  0x35   : > { %s1699_s21 = scalar_select %p44_p9, %s1527_s26, %s46_s17  }
  0x36   : > { %s291_s8 = scalar_lea.hbm %s1859_s0, %s1144_s20  ;;  %s283_s14 = scalar_lea.vmem [#allocation2], %s1074_s18 }
  0x37   : > { %s292_s3 = sshll.u32 %s283_s14, 4  ;;  %p1706_p11 = pnand %p1252_p12, %p55_p3  ;;  %s293_s3 = int_to_ptr.vmem [resolvable:$true] %s292_s3 }
  0x38   : > { %s280_s4 = scalar_lea.sflag [#allocation3], %s279_s22  ;;  %s1440_s19 = scalar_lea.vmem %s293_s3, 256 }
  0x39   : > { %p1429_p2 = pneg %p1706_p11  ;;  %p1441_p13 = scmp.ne.s32.totalorder %s293_s3, %s1440_s19 }
  0x3a   : > { %s1545_s17 = smov [#allocation2]  }
  0x3b   : > { %p1443_p0 = pnand %p1441_p13, %p1429_p2  ;;  %s1445_s15 = sshll.u32 %s1545_s17, 4  ;;  %s1446_s15 = int_to_ptr.vmem [resolvable:$false] %s1445_s15 }
  0x3c   : > { %s1447_s20 = scalar_lea.vmem %s1446_s15, 512  ;;  %p1448_p10 = scmp.lt.s32.totalorder %s293_s3, %s1446_s15 }
  0x3d   : > { %p1444_p5 = pneg %p1443_p0  ;;  %p1449_p1 = scmp.lt.s32.totalorder %s1447_s20, %s1440_s19 }
  0x3f   : > { %p1450_p4 = por %p1449_p1, %p1448_p10 }
  0x41   : > { %p1451_p6 = pnand %p1450_p4, %p1444_p5 }
  0x43   : > { %1454 = shalt.err (!%p1451_p6)
}
  0x44   : > { %s1546_s18 = smov 128   ;;  %s1547_s23 = smov 8  }
  0x45   : > { %1245 = dma.hbm_to_vmem [thread:$0]  (!%p1706_p11), %s291_s8, 256, %s293_s3, %s280_s4, %s1546_s18, %s1546_s18, %s1547_s23  }
  0x46   : > { %304 = sbr.rel (%p1649_p8) target bundleno = 891 (0x37b), region = 44  ;;  %s1717_s22 = sand.u32 (!%p1649_p8), 1, %s1523_s25  }
  0x47   : > { %s1078_s30 = sshll.u32 (!%p1649_p8), %s1717_s22, 4  ;;  %s307_s15 = scalar_lea.sflag (!%p1649_p8), [#allocation3], %s1717_s22 }
  0x48   : > { %s310_s14 = scalar_lea.vmem (!%p1649_p8), [#allocation2], %s1078_s30  ;;  %p1884_p12 = scmp.ne.s32.totalorder (!%p1649_p8), %s1875_s11, 0 }
  0x4b   : > { %1506 = dma.done.wait (%p1884_p12), %s307_s15, 256  }
  0x4c   : > { %1508 = vsyncadd (%p1884_p12), %s307_s15, 4294967040  ;;  %p1885_p3 = scmp.ne.s32.totalorder %s1873_s9, 0 }
  0x4e   : > { %1510 = dma.done.wait (%p1885_p3), [#allocation6], 2048  }
  0x4f   : > { %1512 = vsyncadd (%p1885_p3), [#allocation6], 4294965248  ;;  %v368_v0 = vld [vmem:[%s310_s14] sm:$0xff]  ;;  %v369_v1 = vld [vmem:[%s310_s14 + $0x8] sm:$0xff]  ;;  %v1548_v4 = vmov 0.0   ;;  %vm1549_vm0 = vmmov 0  }
  0x50   : > { %372 = vadd.xlane.f32.xlu0 %v368_v0  ;;  %v1355_v2 = vld [vmem:[#allocation5 + $0x38] sm:$0xff]   ;;  %1183 = vmatprep.subr.bf16.mxu0 %v1548_v4  ;;  %v1357_v13 = vld [vmem:[#allocation5 + $0x30] sm:$0xff]   ;;  %v1359_v15 = vld [vmem:[#allocation5 + $0x28] sm:$0xff]   ;;  %s1081_s10 = sshll.u32 %s1717_s22, 5  ;;  %vm690_vm1 = vcmask 257024   ;;  %s1550_s17 = smov 96  }
  0x51   : > { %v1356_v3 = vld [vmem:[#allocation7 + $0x38] sm:$0xff]   ;;  %1203 = vmatprep.subr.bf16.mxu1 %v1548_v4  ;;  %1184 = vmatpush3.bf16.msra.mxu0 %v1355_v2  ;;  %v1358_v14 = vld [vmem:[#allocation7 + $0x30] sm:$0xff]   ;;  %v1360_v16 = vld [vmem:[#allocation7 + $0x28] sm:$0xff]   ;;  %s1739_s19 = scalar_lea.vmem [#allocation8], %s1081_s10  ;;  %s1551_s20 = smov 32   ;;  %vm677_vm2 = vcmask 125952  }
  0x52   : > { %1204 = vmatpush3.bf16.msra.mxu1 %v1356_v3  ;;  %1185 = vmatprep.subr.bf16.mxu0 %v1548_v4  ;;  %v1361_v17 = vld [vmem:[#allocation5 + $0x20] sm:$0xff]   ;;  %v1363_v19 = vld [vmem:[#allocation5 + $0x18] sm:$0xff]   ;;  %v1365_v21 = vld [vmem:[#allocation5 + $0x10] sm:$0xff]   ;;  %s1552_s18 = smov 64   ;;  %p358_p8 = scmp.lt.s32.totalorder %s1531_s27, 1 }
  0x53   : > { %1205 = vmatprep.subr.bf16.mxu1 %v1548_v4  ;;  %v1362_v18 = vld [vmem:[#allocation7 + $0x20] sm:$0xff]   ;;  %1199 = vmatprep.mubr.msk.bf16.mxu0 %vm1549_vm0, %v1548_v4  ;;  %v1364_v20 = vld [vmem:[#allocation7 + $0x18] sm:$0xff]   ;;  %v1366_v22 = vld [vmem:[#allocation7 + $0x10] sm:$0xff]   ;;  %s1164_s4 = sshll.u32 %s1531_s27, 9  ;;  %s926_s9 = sshll.u32 %s1739_s19, 4  ;;  %s1807_s9 = int_to_ptr.vmem [resolvable:$true] %s926_s9 }
  0x54   : > { %374 = vadd.xlane.f32.xlu0 %v369_v1  ;;  %1219 = vmatprep.mubr.msk.bf16.mxu1 %vm1549_vm0, %v1548_v4  ;;  %v1367_v23 = vld [vmem:[#allocation5 + $0x8] sm:$0xff]   ;;  %v1369_v25 = vld [vmem:[#allocation5] sm:$0xff]   ;;  %s359_s23 = scalar_select %p358_p8, %s1531_s27, 1 }
  0x55   : > { %1186 = vmatpush3.bf16.msra.mxu0 %v1357_v13  ;;  %v1368_v24 = vld [vmem:[#allocation7 + $0x8] sm:$0xff]   ;;  %v1370_v26 = vld [vmem:[#allocation7] sm:$0xff]   ;;  %s1805_s8 = scalar_lea.hbm %s1866_s7, %s1164_s4  ;;  %s908_s10 = scalar_lea.sflag [#allocation4], %s1717_s22 }
  0x56   : > { %1206 = vmatpush3.bf16.msra.mxu1 %v1358_v14  ;;  %1187 = vmatprep.subr.bf16.mxu0 %v1548_v4  ;;  %v1084_v35 = vld [vmem:[%s1860_s1] ss:$0 sm:$0xff]  ;;  %s1145_s30 = sshll.u32 %s359_s23, 6  ;;  %s1553_s27 = smov [#allocation8]  }
  0x57   : > { %1207 = vmatprep.subr.bf16.mxu1 %v1548_v4  ;;  %v1085_v39 = vld [vmem:[%s1861_s2] ss:$0 sm:$0xff]  ;;  %s1756_s3 = scalar_lea.vmem %s1865_s6, %s1145_s30 }
  0x58   : > { %v1094_v44 = vld [vmem:[%s1864_s5] ss:$0 sm:$0xff] }
  0x59   : > { %1188 = vmatpush3.bf16.msra.mxu0 %v1359_v15 }
  0x5a   : > { %1208 = vmatpush3.bf16.msra.mxu1 %v1360_v16  ;;  %1189 = vmatprep.subr.bf16.mxu0 %v1548_v4 }
  0x5b   : > { %1209 = vmatprep.subr.bf16.mxu1 %v1548_v4 }
  0x5d   : > { %1190 = vmatpush3.bf16.msra.mxu0 %v1361_v17 }
  0x5e   : > { %1210 = vmatpush3.bf16.msra.mxu1 %v1362_v18  ;;  %1191 = vmatprep.subr.bf16.mxu0 %v1548_v4 }
  0x5f   : > { %1211 = vmatprep.subr.bf16.mxu1 %v1548_v4 }
  0x61   : > { %1192 = vmatpush3.bf16.msra.mxu0 %v1363_v19 }
  0x62   : > { %1212 = vmatpush3.bf16.msra.mxu1 %v1364_v20  ;;  %1193 = vmatprep.subr.bf16.mxu0 %v1548_v4 }
  0x63   : > { %1213 = vmatprep.subr.bf16.mxu1 %v1548_v4 }
  0x65   : > { %1194 = vmatpush3.bf16.msra.mxu0 %v1365_v21 }
  0x66   : > { %1214 = vmatpush3.bf16.msra.mxu1 %v1366_v22  ;;  %1195 = vmatprep.subr.bf16.mxu0 %v1548_v4 }
  0x67   : > { %1215 = vmatprep.subr.bf16.mxu1 %v1548_v4 }
  0x69   : > { %1196 = vmatpush3.bf16.msra.mxu0 %v1367_v23 }
  0x6a   : > { %1216 = vmatpush3.bf16.msra.mxu1 %v1368_v24  ;;  %1197 = vmatprep.subr.bf16.mxu0 %v1548_v4 }
  0x6b   : > { %1217 = vmatprep.subr.bf16.mxu1 %v1548_v4 }
  0x6d   : > { %1198 = vmatpush3.bf16.msra.mxu0 %v1369_v25 }
  0x6e   : > { %1218 = vmatpush3.bf16.msra.mxu1 %v1370_v26 }
  0xd9   : > { %v373_v5 = vpop.xlane.xlu0 %372 }
  0xda   : > { %v377_v6 = vmul.f32 0.0078125, %v373_v5 }
  0xdc   : > { %v379_v7 = vsub.f32 %v368_v0, %v377_v6 }
  0xdd   : > { %v375_v8 = vpop.xlane.xlu0 %374 }
  0xde   : > { %v378_v9 = vmul.f32 0.0078125, %v375_v8  ;;  %v381_v10 = vmul.f32 %v379_v7, %v379_v7 }
  0xe0   : > { %v380_v11 = vsub.f32 %v369_v1, %v378_v9  ;;  %383 = vadd.xlane.f32.xlu1 %v381_v10 }
  0xe2   : > { %v382_v12 = vmul.f32 %v380_v11, %v380_v11 }
  0xe4   : > { %385 = vadd.xlane.f32.xlu1 %v382_v12 }
 0x169   : > { %v384_v27 = vpop.xlane.xlu1 %383 }
 0x16a   : > { %v387_v28 = vmul.f32 0.0078125, %v384_v27 }
 0x16c   : > { %v389_v29 = vadd.f32 1e-05, %v387_v28 }
 0x16d   : > { %v386_v30 = vpop.xlane.xlu1 %385 }
 0x16e   : > { %1371 = vrsqrt.f32 %v389_v29  ;;  %v388_v31 = vmul.f32 0.0078125, %v386_v30 }
 0x170   : > { %v390_v32 = vadd.f32 1e-05, %v388_v31 }
 0x172   : > { %1373 = vrsqrt.f32 %v390_v32 }
 0x17b   : > { %v1372_v33 = vpop.eup %1371 }
 0x17c   : > { %v393_v34 = vmul.f32 %v1372_v33, %v379_v7 }
 0x17e   : > { %v401_v38 = vmul.f32 %v1084_v35, %v393_v34 }
 0x17f   : > { %v1374_v36 = vpop.eup %1373 }
 0x180   : > { %v394_v37 = vmul.f32 %v1374_v36, %v380_v11  ;;  %v409_v41 = vadd.f32 %v1085_v39, %v401_v38 }
 0x182   : > { %v402_v40 = vmul.f32 %v1084_v35, %v394_v37 }
 0x184   : > { %v410_v42 = vadd.f32 %v1085_v39, %v402_v40 }
 0x186   : > { %v411_v43 = vpack.c.bf16 %v410_v42, %v409_v41 }
 0x188   : > { %1200 = vmatmul.mubr.bf16.vlgmr.msra.gmra.mxu0 %v411_v43  ;;  %1220 = vmatmul.mubr.bf16.vlgmr.msra.gmra.mxu1 %v411_v43 }
 0x248   : > { %v510_v45 = vpop.f32.mrf.mxu0  ;;  %v622_v46 = vpop.f32.mrf.mxu1 }
 0x249   : > { %v623_v47 = vadd.f32 %v1094_v44, %v622_v46 }
 0x24a   : > { %v1201_v48 = vpop.f32.mrf.mxu0  ;;  %v1221_v49 = vpop.f32.mrf.mxu1 }
 0x24b   : > { %v1150_v50 = vpack.c.bf16 %v623_v47, %v623_v47 }
 0x24c   : > { %v513_v51 = vpop.f32.mrf.mxu0  ;;  %v625_v52 = vpop.f32.mrf.mxu1 }
 0x24d   : > { %691 = vst.msk [vmem:[%s1739_s19] sm:$0xf] %vm690_vm1, %v1150_v50  ;;  %v626_v53 = vadd.f32 %v1094_v44, %v625_v52  ;;  %754 = vrot.lane.b32.xlu0 %v1150_v50, %s1550_s17  ;;  %v1316_v54 = vpack.i.bf16 %v513_v51, %v510_v45 }
 0x24e   : > { %v1202_v55 = vpop.f32.mrf.mxu0  ;;  %v1222_v56 = vpop.f32.mrf.mxu1 }
 0x24f   : > { %v1151_v57 = vpack.c.bf16 %v626_v53, %v626_v53  ;;  %1317 = vrot.lane.b32.xlu1 %v1316_v54, %s1550_s17 }
 0x251   : > { %692 = vst.msk [vmem:[%s1739_s19 + $0x4] sm:$0xf] %vm690_vm1, %v1151_v57  ;;  %1327 = vrot.lane.b32.xlu0 %v1316_v54, %s1551_s20 }
 0x253   : > { %1322 = vrot.lane.b32.xlu1 %v1316_v54, %s1552_s18 }
 0x257   : > { %756 = vrot.lane.b32.xlu1 %v1151_v57, %s1550_s17  ;;  %s1455_s17 = scalar_lea.vmem %s1807_s9, 512 }
 0x258   : > { %p1456_p9 = scmp.ne.s32.totalorder %s1807_s9, %s1455_s17 }
 0x25a   : > { %p1457_p11 = pnand %p1456_p9, %p1690_p7 }
 0x25c   : > { %p1458_p2 = pneg %p1457_p11 }
 0x26f   : > { %629 = vxpose.xlu0.b32.start [1/2] (short) (narrow) %v510_v45, 32 }
 0x273   : > { %630 = vxpose.xlu0.b32.end [2/2] (short) (narrow) %v513_v51, 32 }
 0x2bf   : > { %v755_v58 = vpop.permute.xlu0 %754 }
 0x2c0   : > { %1117 = vst.msk [vmem:[%s1739_s19 + $0x8] sm:$0xf] %vm690_vm1, %v755_v58 }
 0x2c1   : > { %v1318_v59 = vpop.permute.xlu1 %1317 }
 0x2c2   : > { %v1319_v60 = vunpack.i.l.bf16 %v1318_v59  ;;  %v1320_v63 = vunpack.i.h.bf16 %v1318_v59 }
 0x2c3   : > { %v1328_v61 = vpop.permute.xlu0 %1327 }
 0x2c4   : > { %701 = vxpose.xlu1.b32.start [1/2] (short) (narrow) %v1319_v60, 32  ;;  %v1329_v0 = vunpack.i.l.bf16 %v1328_v61  ;;  %v1330_v5 = vunpack.i.h.bf16 %v1328_v61 }
 0x2c5   : > { %v1323_v62 = vpop.permute.xlu1 %1322 }
 0x2c6   : > { %v1324_v1 = vunpack.i.l.bf16 %v1323_v62  ;;  %v1325_v2 = vunpack.i.h.bf16 %v1323_v62 }
 0x2c8   : > { %702 = vxpose.xlu1.b32.end [2/2] (short) (narrow) %v1320_v63, 32  ;;  %v1331_v3 = vpack.i.bf16 %v1329_v0, %v1324_v1  ;;  %v1333_v6 = vpack.i.bf16 %v1330_v5, %v1325_v2 }
 0x2c9   : > { %v757_v4 = vpop.permute.xlu1 %756 }
 0x2ca   : > { %1118 = vst.msk [vmem:[%s1739_s19 + $0xc] sm:$0xf] %vm690_vm1, %v757_v4  ;;  %1332 = vxpose.xlu0.b32.start [1/2] (short) (narrow) %v1331_v3, 32 }
 0x2ce   : > { %1334 = vxpose.xlu0.b32.end [2/2] (short) (narrow) %v1333_v6, 32 }
 0x2eb   : > { %v645_v7 = vpop.trf.xlu0 }
 0x2ec   : > { %v1146_v8 = vpack.c.bf16 %v645_v7, %v645_v7 }
 0x2ee   : > { %822 = vrot.lane.b32.xlu1 %v1150_v50, %s1552_s18  ;;  %678 = vst.msk [vmem:[%s1756_s3] sm:$0xf] %vm677_vm2, %v1146_v8 }
 0x2ef   : > { %v646_v9 = vpop.trf.xlu0 }
 0x2f0   : > { %v1147_v10 = vpack.c.bf16 %v646_v9, %v646_v9 }
 0x2f2   : > { %824 = vrot.lane.b32.xlu1 %v1151_v57, %s1552_s18  ;;  %679 = vst.msk [vmem:[%s1756_s3 + $0x4] sm:$0xf] %vm677_vm2, %v1147_v10 }
 0x2f3   : > { %v647_v11 = vpop.trf.xlu0 }
 0x2f4   : > { %v1148_v12 = vpack.c.bf16 %v647_v11, %v647_v11 }
 0x2f6   : > { %890 = vrot.lane.b32.xlu1 %v1150_v50, %s1551_s20  ;;  %680 = vst.msk [vmem:[%s1756_s3 + $0x8] sm:$0xf] %vm677_vm2, %v1148_v12 }
 0x2f7   : > { %v648_v13 = vpop.trf.xlu0 }
 0x2f8   : > { %v1149_v14 = vpack.c.bf16 %v648_v13, %v648_v13 }
 0x2fa   : > { %892 = vrot.lane.b32.xlu1 %v1151_v57, %s1551_s20  ;;  %681 = vst.msk [vmem:[%s1756_s3 + $0xc] sm:$0xf] %vm677_vm2, %v1149_v14  ;;  %s1459_s20 = sshll.u32 %s1553_s27, 4  ;;  %s1460_s20 = int_to_ptr.vmem [resolvable:$false] %s1459_s20 }
 0x2fb   : > { %s1461_s23 = scalar_lea.vmem %s1460_s20, 1024  ;;  %p1462_p13 = scmp.lt.s32.totalorder %s1807_s9, %s1460_s20 }
 0x2fc   : > { %p1463_p0 = scmp.lt.s32.totalorder %s1461_s23, %s1455_s17 }
 0x2fe   : > { %p1464_p5 = por %p1463_p0, %p1462_p13 }
 0x300   : > { %p1465_p10 = pnand %p1464_p5, %p1458_p2 }
 0x340   : > { %v717_v15 = vpop.trf.xlu1 }
 0x341   : > { %v1152_v16 = vpack.c.bf16 %v717_v15, %v717_v15 }
 0x343   : > { %1113 = vst.msk [vmem:[%s1756_s3 + $0x10] sm:$0xf] %vm677_vm2, %v1152_v16 }
 0x344   : > { %v718_v17 = vpop.trf.xlu1 }
 0x345   : > { %v1153_v18 = vpack.c.bf16 %v718_v17, %v718_v17 }
 0x346   : > { %v1335_v19 = vpop.trf.xlu0 }
 0x347   : > { %1114 = vst.msk [vmem:[%s1756_s3 + $0x14] sm:$0xf] %vm677_vm2, %v1153_v18  ;;  %v1339_v20 = vunpack.i.h.bf16 %v1335_v19  ;;  %v1336_v21 = vunpack.i.l.bf16 %v1335_v19 }
 0x348   : > { %v719_v22 = vpop.trf.xlu1 }
 0x349   : > { %v1154_v23 = vpack.c.bf16 %v719_v22, %v719_v22  ;;  %v1160_v24 = vpack.c.bf16 %v1339_v20, %v1339_v20  ;;  %v1156_v25 = vpack.c.bf16 %v1336_v21, %v1336_v21 }
 0x34a   : > { %v1340_v26 = vpop.trf.xlu0 }
 0x34b   : > { %1115 = vst.msk [vmem:[%s1756_s3 + $0x18] sm:$0xf] %vm677_vm2, %v1154_v23  ;;  %1133 = vst.msk [vmem:[%s1756_s3 + $0x30] sm:$0xf] %vm677_vm2, %v1160_v24  ;;  %v1344_v27 = vunpack.i.h.bf16 %v1340_v26  ;;  %v1341_v28 = vunpack.i.l.bf16 %v1340_v26 }
 0x34c   : > { %1123 = vst.msk [vmem:[%s1756_s3 + $0x20] sm:$0xf] %vm677_vm2, %v1156_v25  ;;  %v720_v29 = vpop.trf.xlu1 }
 0x34d   : > { %v1155_v30 = vpack.c.bf16 %v720_v29, %v720_v29  ;;  %v1161_v31 = vpack.c.bf16 %v1344_v27, %v1344_v27  ;;  %v1157_v32 = vpack.c.bf16 %v1341_v28, %v1341_v28 }
 0x34e   : > { %v1345_v33 = vpop.trf.xlu0 }
 0x34f   : > { %1116 = vst.msk [vmem:[%s1756_s3 + $0x1c] sm:$0xf] %vm677_vm2, %v1155_v30  ;;  %1134 = vst.msk [vmem:[%s1756_s3 + $0x34] sm:$0xf] %vm677_vm2, %v1161_v31  ;;  %v1349_v34 = vunpack.i.h.bf16 %v1345_v33  ;;  %v1346_v35 = vunpack.i.l.bf16 %v1345_v33 }
 0x350   : > { %1124 = vst.msk [vmem:[%s1756_s3 + $0x24] sm:$0xf] %vm677_vm2, %v1157_v32 }
 0x351   : > { %v1162_v36 = vpack.c.bf16 %v1349_v34, %v1349_v34  ;;  %v1158_v37 = vpack.c.bf16 %v1346_v35, %v1346_v35 }
 0x352   : > { %v1350_v38 = vpop.trf.xlu0 }
 0x353   : > { %1135 = vst.msk [vmem:[%s1756_s3 + $0x38] sm:$0xf] %vm677_vm2, %v1162_v36  ;;  %1125 = vst.msk [vmem:[%s1756_s3 + $0x28] sm:$0xf] %vm677_vm2, %v1158_v37  ;;  %v1354_v39 = vunpack.i.h.bf16 %v1350_v38  ;;  %v1351_v40 = vunpack.i.l.bf16 %v1350_v38 }
 0x355   : > { %v1163_v41 = vpack.c.bf16 %v1354_v39, %v1354_v39  ;;  %v1159_v42 = vpack.c.bf16 %v1351_v40, %v1351_v40 }
 0x357   : > { %1136 = vst.msk [vmem:[%s1756_s3 + $0x3c] sm:$0xf] %vm677_vm2, %v1163_v41  ;;  %1126 = vst.msk [vmem:[%s1756_s3 + $0x2c] sm:$0xf] %vm677_vm2, %v1159_v42 }
 0x360   : > { %v823_v43 = vpop.permute.xlu1 %822 }
 0x361   : > { %1127 = vst.msk [vmem:[%s1739_s19 + $0x10] sm:$0xf] %vm690_vm1, %v823_v43 }
 0x364   : > { %v825_v44 = vpop.permute.xlu1 %824 }
 0x365   : > { %1128 = vst.msk [vmem:[%s1739_s19 + $0x14] sm:$0xf] %vm690_vm1, %v825_v44 }
 0x368   : > { %v891_v45 = vpop.permute.xlu1 %890 }
 0x369   : > { %1137 = vst.msk [vmem:[%s1739_s19 + $0x18] sm:$0xf] %vm690_vm1, %v891_v45 }
 0x36c   : > { %v893_v46 = vpop.permute.xlu1 %892 }
 0x36d   : > { %1138 = vst.msk [vmem:[%s1739_s19 + $0x1c] sm:$0xf] %vm690_vm1, %v893_v46 }
 0x36e   : > { %1468 = shalt.err (!%p1465_p10)
}
 0x36f   : > { %s1469_s19 = scalar_lea.hbm %s1805_s8, 512  ;;  %s1473_s14 = scalar_lea.hbm %s1866_s7, 1024 }
 0x370   : > { %p1470_p1 = scmp.ne.s32.totalorder %s1805_s8, %s1469_s19  ;;  %p1474_p12 = scmp.lt.s32.totalorder %s1805_s8, %s1866_s7 }
 0x371   : > { %p1475_p3 = scmp.lt.s32.totalorder %s1473_s14, %s1469_s19 }
 0x372   : > { %p1471_p4 = pnand %p1470_p1, %p1690_p7 }
 0x373   : > { %p1476_p8 = por %p1475_p3, %p1474_p12 }
 0x374   : > { %p1472_p6 = pneg %p1471_p4 }
 0x376   : > { %p1477_p9 = pnand %p1476_p8, %p1472_p6 }
 0x378   : > { %1480 = shalt.err (!%p1477_p9)
}
 0x379   : > { %s1554_s11 = smov 4  }
 0x37a   : > { %1233 = dma.vmem_to_hbm [thread:$0]  (%p1690_p7), %s1807_s9, 512, %s1805_s8, %s908_s10, %s1552_s18, %s1552_s18, %s1554_s11  }
 0x37b PF: > { %s952_s13 = sand.u32 1, %s1519_s24   ;;  %p1886_p11 = scmp.ne.s32.totalorder %s1876_s12, 0 }
 0x37c   : > { %p1887_p2 = scmp.ge.s32.totalorder %s1539_s29, 2  ;;  %s953_s17 = scalar_lea.sflag [#allocation4], %s952_s13 }
 0x37e   : > { %p1247_p13 = pnand %p1887_p2, %p1886_p11 }
 0x380   : > { %p1248_p0 = pneg %p1247_p13 }
 0x382   : > { %1514 = dma.done.wait (%p1248_p0), %s953_s17, 512  }
 0x383   : > { %1516 = vsyncadd (%p1248_p0), %s953_s17, 4294966784  ;;  %s25_s29 = sadd.s32 1, %s1539_s29   ;;  %s1888_s16 = sld [smem:[#allocation12_spill]] }
 0x384   : > { %p22_p5 = scmp.ge.s32.totalorder %s25_s29, 4   ;;  %s1889_s24 = smov %s1523_s25 }
 0x385   : > { %s1890_s25 = smov %s1527_s26  ;;  %s1891_s26 = smov %s1699_s21 }
 0x386   : > { %s1892_s27 = smov %s1535_s28  ;;  %24 = sbr.rel (!%p22_p5) target bundleno = 10 (0xa), region = 115 }
 0x389   : > { %s1893_s28 = smov %s1888_s16 }
 0x38b   :  { %958 = vsyncpa [#allocation3], 1 }
 0x38c   :  { %960 = vsyncpa [#allocation3 + $0x1], 1 }
 0x38d   :  { %961 = vsyncpa [#allocation6], 1 }
 0x38e   :  { %962 = vsyncpa [#allocation4], 1 }
 0x38f   :  { %964 = vsyncpa [#allocation4 + $0x1], 1 }

</bundles_post_ra>
